<compile_context>
chip_gen: v7x
topology: tpu7x:2x2x1
jax: 0.10.0
libtpu: 0.0.40
codegen_flags: <defaults>
</compile_context>

<pallas_src>
import math
import functools

import jax
import jax.numpy as jnp
from jax.experimental import pallas as pl
from jax.experimental.pallas import tpu as pltpu


# ---------------------------------------------------------------------------
# Fused kernel factory.
#   refs (in order):
#     x_ref                       (T, BT, Din)     time-major input tile
#     [w_ih_l, w_hh_l, b_l] * L   (Din_l,4H), (H,4H), (1,4H)   per layer
#     fc_w, fc_b                  (H, Opad), (1, Opad)          lane-dense head
#     y_ref (output)              (P, BT, Opad)    last P steps, time-major
#   Gate column order is PyTorch's (i, f, g, o).
# ---------------------------------------------------------------------------
def make_fused_kernel(num_layers, T, P, BT, H, Opad):
    H4 = 4 * H

    def kernel(*refs):
        x_ref = refs[0]
        idx = 1
        layer_refs = []
        for _ in range(num_layers):
            layer_refs.append((refs[idx], refs[idx + 1], refs[idx + 2]))
            idx += 3
        fcw_ref = refs[idx]
        fcb_ref = refs[idx + 1]
        y_ref = refs[idx + 2]

        # ---- hoisted, loop-invariant values -------------------------------
        # sigmoid lanes: i,f in [0,2H) and o in [3H,4H); tanh lane block: g in
        # [2H,3H).  sigmoid(x) = 0.5*(tanh(0.5*x)+1) lets one full-width tanh
        # cover all four gates:   act = tanh(g * s) * s + o
        lane = jax.lax.broadcasted_iota(jnp.int32, (BT, H4), 1)
        is_sig = (lane < 2 * H) | (lane >= 3 * H)
        s_vec = jnp.where(is_sig, 0.5, 1.0).astype(jnp.float32)
        o_vec = jnp.where(is_sig, 0.5, 0.0).astype(jnp.float32)

        # Weights / biases read once (stay resident in vregs / VMEM).
        w_ih = [lr[0][...] for lr in layer_refs]
        w_hh = [lr[1][...] for lr in layer_refs]
        bias = [jnp.broadcast_to(lr[2][...], (BT, H4)) for lr in layer_refs]
        fc_w = fcw_ref[...]
        fc_b = jnp.broadcast_to(fcb_ref[...], (BT, Opad))

        zeros_h = jnp.zeros((BT, H), jnp.float32)
        h = [zeros_h for _ in range(num_layers)]       # recurrent hidden (vregs)
        c = [zeros_h for _ in range(num_layers)]       # recurrent cell   (vregs)
        below = [zeros_h for _ in range(num_layers)]   # latest output of layer l

        # ---- wavefront-unrolled recurrence --------------------------------
        # wall step s: layer l processes timestep t = s - l.  Layers iterate
        # high->low so layer l+1 consumes layer l's output from the PREVIOUS
        # wall step before layer l overwrites it.
        for s in range(T + num_layers - 1):
            for l in reversed(range(num_layers)):
                t = s - l
                if t < 0 or t >= T:
                    continue
                inp = x_ref[t] if l == 0 else below[l - 1]
                gates = (
                    jnp.dot(inp, w_ih[l], preferred_element_type=jnp.float32)
                    + jnp.dot(h[l], w_hh[l], preferred_element_type=jnp.float32)
                    + bias[l]
                )
                act = jnp.tanh(gates * s_vec) * s_vec + o_vec
                i_g = act[:, 0:H]
                f_g = act[:, H:2 * H]
                g_g = act[:, 2 * H:3 * H]
                o_g = act[:, 3 * H:]
                c_new = f_g * c[l] + i_g * g_g
                h_new = o_g * jnp.tanh(c_new)
                c[l] = c_new
                h[l] = h_new
                below[l] = h_new
                # FC head fused per final-layer step (lane-dense 128-col store).
                if l == num_layers - 1 and t >= T - P:
                    y_ref[t - (T - P)] = (
                        jnp.dot(h_new, fc_w, preferred_element_type=jnp.float32)
                        + fc_b
                    ).astype(y_ref.dtype)

    return kernel


# ---------------------------------------------------------------------------
# Public forward, matching LSTM_model.forward semantics.
#   x: (B, T, input_size) batch_first -> (B, pred_len, output_size)
# ---------------------------------------------------------------------------
def lstm_model_forward(x, params, pred_len, batch_tile=None):
    B, T, Din = x.shape
    num_layers = len(params["lstm"])
    H = params["lstm"][0]["w_hh"].shape[0]
    O = params["fc_w"].shape[1]
    P = pred_len
    assert 1 <= P <= T, "pred_len must be in [1, seq_len]"

    # Lane-dense FC head: pad output columns to a multiple of 128.
    Opad = ((O + 127) // 128) * 128

    # Pad batch to a sublane multiple; pick the batch tile (grid axis is
    # "parallel" so larger batches shard across v7x's two TensorCores).
    Bp = ((B + 7) // 8) * 8
    BT = Bp if batch_tile is None else batch_tile
    Bp = ((Bp + BT - 1) // BT) * BT
    n_bt = Bp // BT

    x_tm = jnp.transpose(x, (1, 0, 2)).astype(jnp.float32)    # (T, B, Din)
    x_tm = jnp.pad(x_tm, ((0, 0), (0, Bp - B), (0, 0)))       # (T, Bp, Din)

    fc_w = jnp.pad(params["fc_w"].astype(jnp.float32), ((0, 0), (0, Opad - O)))
    fc_b = jnp.pad(params["fc_b"].astype(jnp.float32), ((0, 0), (0, Opad - O)))

    def full_spec(arr):
        nd = arr.ndim
        return pl.BlockSpec(arr.shape, lambda bt, _nd=nd: (0,) * _nd)

    args = [x_tm]
    in_specs = [pl.BlockSpec((T, BT, Din), lambda bt: (0, bt, 0))]
    for lp in params["lstm"]:
        for a in (lp["w_ih"], lp["w_hh"], lp["b"]):
            a = a.astype(jnp.float32)
            args.append(a)
            in_specs.append(full_spec(a))
    args += [fc_w, fc_b]
    in_specs += [full_spec(fc_w), full_spec(fc_b)]

    kernel = make_fused_kernel(num_layers, T, P, BT, H, Opad)

    y = pl.pallas_call(
        kernel,
        out_shape=jax.ShapeDtypeStruct((P, Bp, Opad), jnp.float32),
        grid=(n_bt,),
        in_specs=in_specs,
        out_specs=pl.BlockSpec((P, BT, Opad), lambda bt: (0, bt, 0)),
        compiler_params=pltpu.CompilerParams(
            dimension_semantics=("parallel",),
            vmem_limit_bytes=64 * 1024 * 1024,
        ),
    )(*args)

    y = y[:, :B, :O]                        # drop batch padding + lane padding
    return jnp.transpose(y, (1, 0, 2))      # (B, P, O)


# ---------------------------------------------------------------------------
# Parameter init (PyTorch convention: gate order i, f, g, o; U(-k, k), k=1/sqrt(H)).
# Weights stored pre-transposed: w_ih (Din, 4H), w_hh (H, 4H), b = b_ih + b_hh.
# ---------------------------------------------------------------------------
def init_params(key, input_size, hidden_size, num_layers, output_size):
    k = 1.0 / math.sqrt(hidden_size)
    params = {"lstm": []}
    for layer in range(num_layers):
        d_in = input_size if layer == 0 else hidden_size
        key, k1, k2, k3, k4 = jax.random.split(key, 5)
        w_ih = jax.random.uniform(k1, (d_in, 4 * hidden_size), jnp.float32, -k, k)
        w_hh = jax.random.uniform(k2, (hidden_size, 4 * hidden_size), jnp.float32, -k, k)
        b_ih = jax.random.uniform(k3, (1, 4 * hidden_size), jnp.float32, -k, k)
        b_hh = jax.random.uniform(k4, (1, 4 * hidden_size), jnp.float32, -k, k)
        params["lstm"].append({"w_ih": w_ih, "w_hh": w_hh, "b": b_ih + b_hh})
    key, k5, k6 = jax.random.split(key, 3)
    params["fc_w"] = jax.random.uniform(k5, (hidden_size, output_size), jnp.float32, -k, k)
    params["fc_b"] = jax.random.uniform(k6, (1, output_size), jnp.float32, -k, k)
    return params


# ---------------------------------------------------------------------------
# Pure-JAX reference (PyTorch gate order i,f,g,o) to validate the kernel.
# ---------------------------------------------------------------------------
def reference_forward(x, params, pred_len):
    B, T, _ = x.shape
    h_seq = x.astype(jnp.float32)
    for lp in params["lstm"]:
        H = lp["w_hh"].shape[0]
        h = jnp.zeros((B, H), jnp.float32)
        c = jnp.zeros((B, H), jnp.float32)
        outs = []
        for t in range(T):
            g = h_seq[:, t, :] @ lp["w_ih"] + h @ lp["w_hh"] + lp["b"]
            i_g = jax.nn.sigmoid(g[:, :H])
            f_g = jax.nn.sigmoid(g[:, H:2 * H])
            g_g = jnp.tanh(g[:, 2 * H:3 * H])
            o_g = jax.nn.sigmoid(g[:, 3 * H:])
            c = f_g * c + i_g * g_g
            h = o_g * jnp.tanh(c)
            outs.append(h)
        h_seq = jnp.stack(outs, axis=1)
    out = h_seq[:, -pred_len:, :]
    return out @ params["fc_w"] + params["fc_b"]


if __name__ == "__main__":
    # Small, shape-consistent configuration.
    input_size, hidden_size, num_layers, output_size, pred_len = 4, 32, 2, 4, 4
    batch, seq_len = 2, 8

    key = jax.random.PRNGKey(0)
    key, kx = jax.random.split(key)
    x = jax.random.normal(kx, (batch, seq_len, input_size), jnp.float32)

    params = init_params(key, input_size, hidden_size, num_layers, output_size)

    fwd = jax.jit(functools.partial(lstm_model_forward, pred_len=pred_len))
    y = jax.block_until_ready(fwd(x, params))
    assert y.shape == (batch, pred_len, output_size), y.shape

    y_ref = reference_forward(x, params, pred_len)
    assert jnp.allclose(y, y_ref, atol=1e-4, rtol=1e-4), "kernel/reference mismatch"

    print("KERNEL_OK")
</pallas_src>

<mosaic_0001>
module attributes {stable_mosaic.version = 11 : i64} {
  func.func @kernel(%arg0: i32, %arg1: memref<8x8x4xf32, #tpu.memory_space<vmem>>, %arg2: memref<4x128xf32, #tpu.memory_space<vmem>>, %arg3: memref<32x128xf32, #tpu.memory_space<vmem>>, %arg4: memref<1x128xf32, #tpu.memory_space<vmem>>, %arg5: memref<32x128xf32, #tpu.memory_space<vmem>>, %arg6: memref<32x128xf32, #tpu.memory_space<vmem>>, %arg7: memref<1x128xf32, #tpu.memory_space<vmem>>, %arg8: memref<32x128xf32, #tpu.memory_space<vmem>>, %arg9: memref<1x128xf32, #tpu.memory_space<vmem>>, %arg10: memref<4x8x128xf32, #tpu.memory_space<vmem>>) attributes {dimension_semantics = [#tpu.dimension_semantics<parallel>], iteration_bounds = array<i64: 1>, scalar_prefetch = 0 : i64, scratch_operands = 0 : i64, tpu.core_type = #tpu.core_type<tc>, window_params = [{transform_indices = @transform_0, window_bounds = array<i64: 8, 8, 4>}, {pipeline_mode = #tpu.pipeline_mode<synchronous>, transform_indices = @transform_1, window_bounds = array<i64: 4, 128>}, {pipeline_mode = #tpu.pipeline_mode<synchronous>, transform_indices = @transform_2, window_bounds = array<i64: 32, 128>}, {pipeline_mode = #tpu.pipeline_mode<synchronous>, transform_indices = @transform_3, window_bounds = array<i64: 1, 128>}, {pipeline_mode = #tpu.pipeline_mode<synchronous>, transform_indices = @transform_4, window_bounds = array<i64: 32, 128>}, {pipeline_mode = #tpu.pipeline_mode<synchronous>, transform_indices = @transform_5, window_bounds = array<i64: 32, 128>}, {pipeline_mode = #tpu.pipeline_mode<synchronous>, transform_indices = @transform_6, window_bounds = array<i64: 1, 128>}, {pipeline_mode = #tpu.pipeline_mode<synchronous>, transform_indices = @transform_7, window_bounds = array<i64: 32, 128>}, {pipeline_mode = #tpu.pipeline_mode<synchronous>, transform_indices = @transform_8, window_bounds = array<i64: 1, 128>}, {transform_indices = @transform_9, window_bounds = array<i64: 4, 8, 128>}]} {
    %0 = tpu.iota {dimensions = array<i32: 1>} : vector<8x128xi32>
    %c64_i32 = arith.constant 64 : i32
    %1 = vector.broadcast %c64_i32 : i32 to vector<8x128xi32>
    %2 = arith.cmpi slt, %0, %1 : vector<8x128xi32>
    %c96_i32 = arith.constant 96 : i32
    %3 = vector.broadcast %c96_i32 : i32 to vector<8x128xi32>
    %4 = arith.cmpi sge, %0, %3 : vector<8x128xi32>
    %5 = arith.ori %2, %4 : vector<8x128xi1>
    %cst = arith.constant 5.000000e-01 : f32
    %cst_0 = arith.constant 1.000000e+00 : f32
    %6 = vector.broadcast %cst : f32 to vector<8x128xf32>
    %7 = vector.broadcast %cst_0 : f32 to vector<8x128xf32>
    %8 = arith.select %5, %6, %7 : vector<8x128xi1>, vector<8x128xf32>
    %cst_1 = arith.constant 5.000000e-01 : f32
    %cst_2 = arith.constant 0.000000e+00 : f32
    %9 = vector.broadcast %cst_1 : f32 to vector<8x128xf32>
    %10 = vector.broadcast %cst_2 : f32 to vector<8x128xf32>
    %11 = arith.select %5, %9, %10 : vector<8x128xi1>, vector<8x128xf32>
    %c0 = arith.constant 0 : index
    %c0_3 = arith.constant 0 : index
    %12 = vector.load %arg2[%c0, %c0_3] : memref<4x128xf32, #tpu.memory_space<vmem>>, vector<4x128xf32>
    %c0_4 = arith.constant 0 : index
    %c0_5 = arith.constant 0 : index
    %13 = vector.load %arg5[%c0_4, %c0_5] : memref<32x128xf32, #tpu.memory_space<vmem>>, vector<32x128xf32>
    %c0_6 = arith.constant 0 : index
    %c0_7 = arith.constant 0 : index
    %14 = vector.load %arg3[%c0_6, %c0_7] : memref<32x128xf32, #tpu.memory_space<vmem>>, vector<32x128xf32>
    %c0_8 = arith.constant 0 : index
    %c0_9 = arith.constant 0 : index
    %15 = vector.load %arg6[%c0_8, %c0_9] : memref<32x128xf32, #tpu.memory_space<vmem>>, vector<32x128xf32>
    %c0_10 = arith.constant 0 : index
    %c0_11 = arith.constant 0 : index
    %16 = vector.load %arg4[%c0_10, %c0_11] : memref<1x128xf32, #tpu.memory_space<vmem>>, vector<1x128xf32>
    %17 = vector.shape_cast %16 : vector<1x128xf32> to vector<1x128xf32>
    %18 = vector.broadcast %17 : vector<1x128xf32> to vector<8x128xf32>
    %c0_12 = arith.constant 0 : index
    %c0_13 = arith.constant 0 : index
    %19 = vector.load %arg7[%c0_12, %c0_13] : memref<1x128xf32, #tpu.memory_space<vmem>>, vector<1x128xf32>
    %20 = vector.shape_cast %19 : vector<1x128xf32> to vector<1x128xf32>
    %21 = vector.broadcast %20 : vector<1x128xf32> to vector<8x128xf32>
    %c0_14 = arith.constant 0 : index
    %c0_15 = arith.constant 0 : index
    %22 = vector.load %arg8[%c0_14, %c0_15] : memref<32x128xf32, #tpu.memory_space<vmem>>, vector<32x128xf32>
    %c0_16 = arith.constant 0 : index
    %c0_17 = arith.constant 0 : index
    %23 = vector.load %arg9[%c0_16, %c0_17] : memref<1x128xf32, #tpu.memory_space<vmem>>, vector<1x128xf32>
    %24 = vector.shape_cast %23 : vector<1x128xf32> to vector<1x128xf32>
    %25 = vector.broadcast %24 : vector<1x128xf32> to vector<8x128xf32>
    %cst_18 = arith.constant 0.000000e+00 : f32
    %26 = vector.broadcast %cst_18 : f32 to vector<8x32xf32>
    %c0_19 = arith.constant 0 : index
    %c0_20 = arith.constant 0 : index
    %c0_21 = arith.constant 0 : index
    %27 = vector.load %arg1[%c0_19, %c0_20, %c0_21] : memref<8x8x4xf32, #tpu.memory_space<vmem>>, vector<1x8x4xf32>
    %28 = vector.shape_cast %27 : vector<1x8x4xf32> to vector<8x4xf32>
    %cst_22 = arith.constant dense<0.000000e+00> : vector<8x128xf32>
    %29 = tpu.matmul %28, %12, %cst_22 {dimension_numbers = #tpu.dot_dimension_numbers<[1], [0], [0], [1], [0, 0, 1, 1], [], []>} : vector<8x4xf32>, vector<4x128xf32>, vector<8x128xf32> -> vector<8x128xf32>
    %cst_23 = arith.constant dense<0.000000e+00> : vector<8x128xf32>
    %30 = tpu.matmul %26, %14, %cst_23 {dimension_numbers = #tpu.dot_dimension_numbers<[1], [0], [0], [1], [0, 0, 1, 1], [], []>} : vector<8x32xf32>, vector<32x128xf32>, vector<8x128xf32> -> vector<8x128xf32>
    %31 = arith.addf %29, %30 : vector<8x128xf32>
    %32 = arith.addf %31, %18 : vector<8x128xf32>
    %33 = arith.mulf %32, %8 : vector<8x128xf32>
    %34 = math.tanh %33 : vector<8x128xf32>
    %35 = arith.mulf %34, %8 : vector<8x128xf32>
    %36 = arith.addf %35, %11 : vector<8x128xf32>
    %37 = vector.extract_strided_slice %36 {offsets = [0, 0], sizes = [8, 32], strides = [1, 1]} : vector<8x128xf32> to vector<8x32xf32>
    %38 = vector.extract_strided_slice %36 {offsets = [0, 32], sizes = [8, 32], strides = [1, 1]} : vector<8x128xf32> to vector<8x32xf32>
    %39 = vector.extract_strided_slice %36 {offsets = [0, 64], sizes = [8, 32], strides = [1, 1]} : vector<8x128xf32> to vector<8x32xf32>
    %40 = vector.extract_strided_slice %36 {offsets = [0, 96], sizes = [8, 32], strides = [1, 1]} : vector<8x128xf32> to vector<8x32xf32>
    %41 = arith.mulf %38, %26 : vector<8x32xf32>
    %42 = arith.mulf %37, %39 : vector<8x32xf32>
    %43 = arith.addf %41, %42 : vector<8x32xf32>
    %44 = math.tanh %43 : vector<8x32xf32>
    %45 = arith.mulf %40, %44 : vector<8x32xf32>
    %cst_24 = arith.constant dense<0.000000e+00> : vector<8x128xf32>
    %46 = tpu.matmul %45, %13, %cst_24 {dimension_numbers = #tpu.dot_dimension_numbers<[1], [0], [0], [1], [0, 0, 1, 1], [], []>} : vector<8x32xf32>, vector<32x128xf32>, vector<8x128xf32> -> vector<8x128xf32>
    %cst_25 = arith.constant dense<0.000000e+00> : vector<8x128xf32>
    %47 = tpu.matmul %26, %15, %cst_25 {dimension_numbers = #tpu.dot_dimension_numbers<[1], [0], [0], [1], [0, 0, 1, 1], [], []>} : vector<8x32xf32>, vector<32x128xf32>, vector<8x128xf32> -> vector<8x128xf32>
    %48 = arith.addf %46, %47 : vector<8x128xf32>
    %49 = arith.addf %48, %21 : vector<8x128xf32>
    %50 = arith.mulf %49, %8 : vector<8x128xf32>
    %51 = math.tanh %50 : vector<8x128xf32>
    %52 = arith.mulf %51, %8 : vector<8x128xf32>
    %53 = arith.addf %52, %11 : vector<8x128xf32>
    %54 = vector.extract_strided_slice %53 {offsets = [0, 0], sizes = [8, 32], strides = [1, 1]} : vector<8x128xf32> to vector<8x32xf32>
    %55 = vector.extract_strided_slice %53 {offsets = [0, 32], sizes = [8, 32], strides = [1, 1]} : vector<8x128xf32> to vector<8x32xf32>
    %56 = vector.extract_strided_slice %53 {offsets = [0, 64], sizes = [8, 32], strides = [1, 1]} : vector<8x128xf32> to vector<8x32xf32>
    %57 = vector.extract_strided_slice %53 {offsets = [0, 96], sizes = [8, 32], strides = [1, 1]} : vector<8x128xf32> to vector<8x32xf32>
    %58 = arith.mulf %55, %26 : vector<8x32xf32>
    %59 = arith.mulf %54, %56 : vector<8x32xf32>
    %60 = arith.addf %58, %59 : vector<8x32xf32>
    %61 = math.tanh %60 : vector<8x32xf32>
    %62 = arith.mulf %57, %61 : vector<8x32xf32>
    %c1 = arith.constant 1 : index
    %c0_26 = arith.constant 0 : index
    %c0_27 = arith.constant 0 : index
    %63 = vector.load %arg1[%c1, %c0_26, %c0_27] : memref<8x8x4xf32, #tpu.memory_space<vmem>>, vector<1x8x4xf32>
    %64 = vector.shape_cast %63 : vector<1x8x4xf32> to vector<8x4xf32>
    %cst_28 = arith.constant dense<0.000000e+00> : vector<8x128xf32>
    %65 = tpu.matmul %64, %12, %cst_28 {dimension_numbers = #tpu.dot_dimension_numbers<[1], [0], [0], [1], [0, 0, 1, 1], [], []>} : vector<8x4xf32>, vector<4x128xf32>, vector<8x128xf32> -> vector<8x128xf32>
    %cst_29 = arith.constant dense<0.000000e+00> : vector<8x128xf32>
    %66 = tpu.matmul %45, %14, %cst_29 {dimension_numbers = #tpu.dot_dimension_numbers<[1], [0], [0], [1], [0, 0, 1, 1], [], []>} : vector<8x32xf32>, vector<32x128xf32>, vector<8x128xf32> -> vector<8x128xf32>
    %67 = arith.addf %65, %66 : vector<8x128xf32>
    %68 = arith.addf %67, %18 : vector<8x128xf32>
    %69 = arith.mulf %68, %8 : vector<8x128xf32>
    %70 = math.tanh %69 : vector<8x128xf32>
    %71 = arith.mulf %70, %8 : vector<8x128xf32>
    %72 = arith.addf %71, %11 : vector<8x128xf32>
    %73 = vector.extract_strided_slice %72 {offsets = [0, 0], sizes = [8, 32], strides = [1, 1]} : vector<8x128xf32> to vector<8x32xf32>
    %74 = vector.extract_strided_slice %72 {offsets = [0, 32], sizes = [8, 32], strides = [1, 1]} : vector<8x128xf32> to vector<8x32xf32>
    %75 = vector.extract_strided_slice %72 {offsets = [0, 64], sizes = [8, 32], strides = [1, 1]} : vector<8x128xf32> to vector<8x32xf32>
    %76 = vector.extract_strided_slice %72 {offsets = [0, 96], sizes = [8, 32], strides = [1, 1]} : vector<8x128xf32> to vector<8x32xf32>
    %77 = arith.mulf %74, %43 : vector<8x32xf32>
    %78 = arith.mulf %73, %75 : vector<8x32xf32>
    %79 = arith.addf %77, %78 : vector<8x32xf32>
    %80 = math.tanh %79 : vector<8x32xf32>
    %81 = arith.mulf %76, %80 : vector<8x32xf32>
    %cst_30 = arith.constant dense<0.000000e+00> : vector<8x128xf32>
    %82 = tpu.matmul %81, %13, %cst_30 {dimension_numbers = #tpu.dot_dimension_numbers<[1], [0], [0], [1], [0, 0, 1, 1], [], []>} : vector<8x32xf32>, vector<32x128xf32>, vector<8x128xf32> -> vector<8x128xf32>
    %cst_31 = arith.constant dense<0.000000e+00> : vector<8x128xf32>
    %83 = tpu.matmul %62, %15, %cst_31 {dimension_numbers = #tpu.dot_dimension_numbers<[1], [0], [0], [1], [0, 0, 1, 1], [], []>} : vector<8x32xf32>, vector<32x128xf32>, vector<8x128xf32> -> vector<8x128xf32>
    %84 = arith.addf %82, %83 : vector<8x128xf32>
    %85 = arith.addf %84, %21 : vector<8x128xf32>
    %86 = arith.mulf %85, %8 : vector<8x128xf32>
    %87 = math.tanh %86 : vector<8x128xf32>
    %88 = arith.mulf %87, %8 : vector<8x128xf32>
    %89 = arith.addf %88, %11 : vector<8x128xf32>
    %90 = vector.extract_strided_slice %89 {offsets = [0, 0], sizes = [8, 32], strides = [1, 1]} : vector<8x128xf32> to vector<8x32xf32>
    %91 = vector.extract_strided_slice %89 {offsets = [0, 32], sizes = [8, 32], strides = [1, 1]} : vector<8x128xf32> to vector<8x32xf32>
    %92 = vector.extract_strided_slice %89 {offsets = [0, 64], sizes = [8, 32], strides = [1, 1]} : vector<8x128xf32> to vector<8x32xf32>
    %93 = vector.extract_strided_slice %89 {offsets = [0, 96], sizes = [8, 32], strides = [1, 1]} : vector<8x128xf32> to vector<8x32xf32>
    %94 = arith.mulf %91, %60 : vector<8x32xf32>
    %95 = arith.mulf %90, %92 : vector<8x32xf32>
    %96 = arith.addf %94, %95 : vector<8x32xf32>
    %97 = math.tanh %96 : vector<8x32xf32>
    %98 = arith.mulf %93, %97 : vector<8x32xf32>
    %c2 = arith.constant 2 : index
    %c0_32 = arith.constant 0 : index
    %c0_33 = arith.constant 0 : index
    %99 = vector.load %arg1[%c2, %c0_32, %c0_33] : memref<8x8x4xf32, #tpu.memory_space<vmem>>, vector<1x8x4xf32>
    %100 = vector.shape_cast %99 : vector<1x8x4xf32> to vector<8x4xf32>
    %cst_34 = arith.constant dense<0.000000e+00> : vector<8x128xf32>
    %101 = tpu.matmul %100, %12, %cst_34 {dimension_numbers = #tpu.dot_dimension_numbers<[1], [0], [0], [1], [0, 0, 1, 1], [], []>} : vector<8x4xf32>, vector<4x128xf32>, vector<8x128xf32> -> vector<8x128xf32>
    %cst_35 = arith.constant dense<0.000000e+00> : vector<8x128xf32>
    %102 = tpu.matmul %81, %14, %cst_35 {dimension_numbers = #tpu.dot_dimension_numbers<[1], [0], [0], [1], [0, 0, 1, 1], [], []>} : vector<8x32xf32>, vector<32x128xf32>, vector<8x128xf32> -> vector<8x128xf32>
    %103 = arith.addf %101, %102 : vector<8x128xf32>
    %104 = arith.addf %103, %18 : vector<8x128xf32>
    %105 = arith.mulf %104, %8 : vector<8x128xf32>
    %106 = math.tanh %105 : vector<8x128xf32>
    %107 = arith.mulf %106, %8 : vector<8x128xf32>
    %108 = arith.addf %107, %11 : vector<8x128xf32>
    %109 = vector.extract_strided_slice %108 {offsets = [0, 0], sizes = [8, 32], strides = [1, 1]} : vector<8x128xf32> to vector<8x32xf32>
    %110 = vector.extract_strided_slice %108 {offsets = [0, 32], sizes = [8, 32], strides = [1, 1]} : vector<8x128xf32> to vector<8x32xf32>
    %111 = vector.extract_strided_slice %108 {offsets = [0, 64], sizes = [8, 32], strides = [1, 1]} : vector<8x128xf32> to vector<8x32xf32>
    %112 = vector.extract_strided_slice %108 {offsets = [0, 96], sizes = [8, 32], strides = [1, 1]} : vector<8x128xf32> to vector<8x32xf32>
    %113 = arith.mulf %110, %79 : vector<8x32xf32>
    %114 = arith.mulf %109, %111 : vector<8x32xf32>
    %115 = arith.addf %113, %114 : vector<8x32xf32>
    %116 = math.tanh %115 : vector<8x32xf32>
    %117 = arith.mulf %112, %116 : vector<8x32xf32>
    %cst_36 = arith.constant dense<0.000000e+00> : vector<8x128xf32>
    %118 = tpu.matmul %117, %13, %cst_36 {dimension_numbers = #tpu.dot_dimension_numbers<[1], [0], [0], [1], [0, 0, 1, 1], [], []>} : vector<8x32xf32>, vector<32x128xf32>, vector<8x128xf32> -> vector<8x128xf32>
    %cst_37 = arith.constant dense<0.000000e+00> : vector<8x128xf32>
    %119 = tpu.matmul %98, %15, %cst_37 {dimension_numbers = #tpu.dot_dimension_numbers<[1], [0], [0], [1], [0, 0, 1, 1], [], []>} : vector<8x32xf32>, vector<32x128xf32>, vector<8x128xf32> -> vector<8x128xf32>
    %120 = arith.addf %118, %119 : vector<8x128xf32>
    %121 = arith.addf %120, %21 : vector<8x128xf32>
    %122 = arith.mulf %121, %8 : vector<8x128xf32>
    %123 = math.tanh %122 : vector<8x128xf32>
    %124 = arith.mulf %123, %8 : vector<8x128xf32>
    %125 = arith.addf %124, %11 : vector<8x128xf32>
    %126 = vector.extract_strided_slice %125 {offsets = [0, 0], sizes = [8, 32], strides = [1, 1]} : vector<8x128xf32> to vector<8x32xf32>
    %127 = vector.extract_strided_slice %125 {offsets = [0, 32], sizes = [8, 32], strides = [1, 1]} : vector<8x128xf32> to vector<8x32xf32>
    %128 = vector.extract_strided_slice %125 {offsets = [0, 64], sizes = [8, 32], strides = [1, 1]} : vector<8x128xf32> to vector<8x32xf32>
    %129 = vector.extract_strided_slice %125 {offsets = [0, 96], sizes = [8, 32], strides = [1, 1]} : vector<8x128xf32> to vector<8x32xf32>
    %130 = arith.mulf %127, %96 : vector<8x32xf32>
    %131 = arith.mulf %126, %128 : vector<8x32xf32>
    %132 = arith.addf %130, %131 : vector<8x32xf32>
    %133 = math.tanh %132 : vector<8x32xf32>
    %134 = arith.mulf %129, %133 : vector<8x32xf32>
    %c3 = arith.constant 3 : index
    %c0_38 = arith.constant 0 : index
    %c0_39 = arith.constant 0 : index
    %135 = vector.load %arg1[%c3, %c0_38, %c0_39] : memref<8x8x4xf32, #tpu.memory_space<vmem>>, vector<1x8x4xf32>
    %136 = vector.shape_cast %135 : vector<1x8x4xf32> to vector<8x4xf32>
    %cst_40 = arith.constant dense<0.000000e+00> : vector<8x128xf32>
    %137 = tpu.matmul %136, %12, %cst_40 {dimension_numbers = #tpu.dot_dimension_numbers<[1], [0], [0], [1], [0, 0, 1, 1], [], []>} : vector<8x4xf32>, vector<4x128xf32>, vector<8x128xf32> -> vector<8x128xf32>
    %cst_41 = arith.constant dense<0.000000e+00> : vector<8x128xf32>
    %138 = tpu.matmul %117, %14, %cst_41 {dimension_numbers = #tpu.dot_dimension_numbers<[1], [0], [0], [1], [0, 0, 1, 1], [], []>} : vector<8x32xf32>, vector<32x128xf32>, vector<8x128xf32> -> vector<8x128xf32>
    %139 = arith.addf %137, %138 : vector<8x128xf32>
    %140 = arith.addf %139, %18 : vector<8x128xf32>
    %141 = arith.mulf %140, %8 : vector<8x128xf32>
    %142 = math.tanh %141 : vector<8x128xf32>
    %143 = arith.mulf %142, %8 : vector<8x128xf32>
    %144 = arith.addf %143, %11 : vector<8x128xf32>
    %145 = vector.extract_strided_slice %144 {offsets = [0, 0], sizes = [8, 32], strides = [1, 1]} : vector<8x128xf32> to vector<8x32xf32>
    %146 = vector.extract_strided_slice %144 {offsets = [0, 32], sizes = [8, 32], strides = [1, 1]} : vector<8x128xf32> to vector<8x32xf32>
    %147 = vector.extract_strided_slice %144 {offsets = [0, 64], sizes = [8, 32], strides = [1, 1]} : vector<8x128xf32> to vector<8x32xf32>
    %148 = vector.extract_strided_slice %144 {offsets = [0, 96], sizes = [8, 32], strides = [1, 1]} : vector<8x128xf32> to vector<8x32xf32>
    %149 = arith.mulf %146, %115 : vector<8x32xf32>
    %150 = arith.mulf %145, %147 : vector<8x32xf32>
    %151 = arith.addf %149, %150 : vector<8x32xf32>
    %152 = math.tanh %151 : vector<8x32xf32>
    %153 = arith.mulf %148, %152 : vector<8x32xf32>
    %cst_42 = arith.constant dense<0.000000e+00> : vector<8x128xf32>
    %154 = tpu.matmul %153, %13, %cst_42 {dimension_numbers = #tpu.dot_dimension_numbers<[1], [0], [0], [1], [0, 0, 1, 1], [], []>} : vector<8x32xf32>, vector<32x128xf32>, vector<8x128xf32> -> vector<8x128xf32>
    %cst_43 = arith.constant dense<0.000000e+00> : vector<8x128xf32>
    %155 = tpu.matmul %134, %15, %cst_43 {dimension_numbers = #tpu.dot_dimension_numbers<[1], [0], [0], [1], [0, 0, 1, 1], [], []>} : vector<8x32xf32>, vector<32x128xf32>, vector<8x128xf32> -> vector<8x128xf32>
    %156 = arith.addf %154, %155 : vector<8x128xf32>
    %157 = arith.addf %156, %21 : vector<8x128xf32>
    %158 = arith.mulf %157, %8 : vector<8x128xf32>
    %159 = math.tanh %158 : vector<8x128xf32>
    %160 = arith.mulf %159, %8 : vector<8x128xf32>
    %161 = arith.addf %160, %11 : vector<8x128xf32>
    %162 = vector.extract_strided_slice %161 {offsets = [0, 0], sizes = [8, 32], strides = [1, 1]} : vector<8x128xf32> to vector<8x32xf32>
    %163 = vector.extract_strided_slice %161 {offsets = [0, 32], sizes = [8, 32], strides = [1, 1]} : vector<8x128xf32> to vector<8x32xf32>
    %164 = vector.extract_strided_slice %161 {offsets = [0, 64], sizes = [8, 32], strides = [1, 1]} : vector<8x128xf32> to vector<8x32xf32>
    %165 = vector.extract_strided_slice %161 {offsets = [0, 96], sizes = [8, 32], strides = [1, 1]} : vector<8x128xf32> to vector<8x32xf32>
    %166 = arith.mulf %163, %132 : vector<8x32xf32>
    %167 = arith.mulf %162, %164 : vector<8x32xf32>
    %168 = arith.addf %166, %167 : vector<8x32xf32>
    %169 = math.tanh %168 : vector<8x32xf32>
    %170 = arith.mulf %165, %169 : vector<8x32xf32>
    %c4 = arith.constant 4 : index
    %c0_44 = arith.constant 0 : index
    %c0_45 = arith.constant 0 : index
    %171 = vector.load %arg1[%c4, %c0_44, %c0_45] : memref<8x8x4xf32, #tpu.memory_space<vmem>>, vector<1x8x4xf32>
    %172 = vector.shape_cast %171 : vector<1x8x4xf32> to vector<8x4xf32>
    %cst_46 = arith.constant dense<0.000000e+00> : vector<8x128xf32>
    %173 = tpu.matmul %172, %12, %cst_46 {dimension_numbers = #tpu.dot_dimension_numbers<[1], [0], [0], [1], [0, 0, 1, 1], [], []>} : vector<8x4xf32>, vector<4x128xf32>, vector<8x128xf32> -> vector<8x128xf32>
    %cst_47 = arith.constant dense<0.000000e+00> : vector<8x128xf32>
    %174 = tpu.matmul %153, %14, %cst_47 {dimension_numbers = #tpu.dot_dimension_numbers<[1], [0], [0], [1], [0, 0, 1, 1], [], []>} : vector<8x32xf32>, vector<32x128xf32>, vector<8x128xf32> -> vector<8x128xf32>
    %175 = arith.addf %173, %174 : vector<8x128xf32>
    %176 = arith.addf %175, %18 : vector<8x128xf32>
    %177 = arith.mulf %176, %8 : vector<8x128xf32>
    %178 = math.tanh %177 : vector<8x128xf32>
    %179 = arith.mulf %178, %8 : vector<8x128xf32>
    %180 = arith.addf %179, %11 : vector<8x128xf32>
    %181 = vector.extract_strided_slice %180 {offsets = [0, 0], sizes = [8, 32], strides = [1, 1]} : vector<8x128xf32> to vector<8x32xf32>
    %182 = vector.extract_strided_slice %180 {offsets = [0, 32], sizes = [8, 32], strides = [1, 1]} : vector<8x128xf32> to vector<8x32xf32>
    %183 = vector.extract_strided_slice %180 {offsets = [0, 64], sizes = [8, 32], strides = [1, 1]} : vector<8x128xf32> to vector<8x32xf32>
    %184 = vector.extract_strided_slice %180 {offsets = [0, 96], sizes = [8, 32], strides = [1, 1]} : vector<8x128xf32> to vector<8x32xf32>
    %185 = arith.mulf %182, %151 : vector<8x32xf32>
    %186 = arith.mulf %181, %183 : vector<8x32xf32>
    %187 = arith.addf %185, %186 : vector<8x32xf32>
    %188 = math.tanh %187 : vector<8x32xf32>
    %189 = arith.mulf %184, %188 : vector<8x32xf32>
    %cst_48 = arith.constant dense<0.000000e+00> : vector<8x128xf32>
    %190 = tpu.matmul %189, %13, %cst_48 {dimension_numbers = #tpu.dot_dimension_numbers<[1], [0], [0], [1], [0, 0, 1, 1], [], []>} : vector<8x32xf32>, vector<32x128xf32>, vector<8x128xf32> -> vector<8x128xf32>
    %cst_49 = arith.constant dense<0.000000e+00> : vector<8x128xf32>
    %191 = tpu.matmul %170, %15, %cst_49 {dimension_numbers = #tpu.dot_dimension_numbers<[1], [0], [0], [1], [0, 0, 1, 1], [], []>} : vector<8x32xf32>, vector<32x128xf32>, vector<8x128xf32> -> vector<8x128xf32>
    %192 = arith.addf %190, %191 : vector<8x128xf32>
    %193 = arith.addf %192, %21 : vector<8x128xf32>
    %194 = arith.mulf %193, %8 : vector<8x128xf32>
    %195 = math.tanh %194 : vector<8x128xf32>
    %196 = arith.mulf %195, %8 : vector<8x128xf32>
    %197 = arith.addf %196, %11 : vector<8x128xf32>
    %198 = vector.extract_strided_slice %197 {offsets = [0, 0], sizes = [8, 32], strides = [1, 1]} : vector<8x128xf32> to vector<8x32xf32>
    %199 = vector.extract_strided_slice %197 {offsets = [0, 32], sizes = [8, 32], strides = [1, 1]} : vector<8x128xf32> to vector<8x32xf32>
    %200 = vector.extract_strided_slice %197 {offsets = [0, 64], sizes = [8, 32], strides = [1, 1]} : vector<8x128xf32> to vector<8x32xf32>
    %201 = vector.extract_strided_slice %197 {offsets = [0, 96], sizes = [8, 32], strides = [1, 1]} : vector<8x128xf32> to vector<8x32xf32>
    %202 = arith.mulf %199, %168 : vector<8x32xf32>
    %203 = arith.mulf %198, %200 : vector<8x32xf32>
    %204 = arith.addf %202, %203 : vector<8x32xf32>
    %205 = math.tanh %204 : vector<8x32xf32>
    %206 = arith.mulf %201, %205 : vector<8x32xf32>
    %cst_50 = arith.constant dense<0.000000e+00> : vector<8x128xf32>
    %207 = tpu.matmul %206, %22, %cst_50 {dimension_numbers = #tpu.dot_dimension_numbers<[1], [0], [0], [1], [0, 0, 1, 1], [], []>} : vector<8x32xf32>, vector<32x128xf32>, vector<8x128xf32> -> vector<8x128xf32>
    %208 = arith.addf %207, %25 : vector<8x128xf32>
    %c0_51 = arith.constant 0 : index
    %c0_52 = arith.constant 0 : index
    %c0_53 = arith.constant 0 : index
    %209 = vector.load %arg10[%c0_51, %c0_52, %c0_53] : memref<4x8x128xf32, #tpu.memory_space<vmem>>, vector<1x8x128xf32>
    %210 = vector.shape_cast %209 : vector<1x8x128xf32> to vector<8x128xf32>
    %211 = vector.shape_cast %208 : vector<8x128xf32> to vector<1x8x128xf32>
    tpu.vector_store %arg10[%c0_51, %c0_52, %c0_53], %211 {strides = array<i32>} : memref<4x8x128xf32, #tpu.memory_space<vmem>>, vector<1x8x128xf32>,
    %c5 = arith.constant 5 : index
    %c0_54 = arith.constant 0 : index
    %c0_55 = arith.constant 0 : index
    %212 = vector.load %arg1[%c5, %c0_54, %c0_55] : memref<8x8x4xf32, #tpu.memory_space<vmem>>, vector<1x8x4xf32>
    %213 = vector.shape_cast %212 : vector<1x8x4xf32> to vector<8x4xf32>
    %cst_56 = arith.constant dense<0.000000e+00> : vector<8x128xf32>
    %214 = tpu.matmul %213, %12, %cst_56 {dimension_numbers = #tpu.dot_dimension_numbers<[1], [0], [0], [1], [0, 0, 1, 1], [], []>} : vector<8x4xf32>, vector<4x128xf32>, vector<8x128xf32> -> vector<8x128xf32>
    %cst_57 = arith.constant dense<0.000000e+00> : vector<8x128xf32>
    %215 = tpu.matmul %189, %14, %cst_57 {dimension_numbers = #tpu.dot_dimension_numbers<[1], [0], [0], [1], [0, 0, 1, 1], [], []>} : vector<8x32xf32>, vector<32x128xf32>, vector<8x128xf32> -> vector<8x128xf32>
    %216 = arith.addf %214, %215 : vector<8x128xf32>
    %217 = arith.addf %216, %18 : vector<8x128xf32>
    %218 = arith.mulf %217, %8 : vector<8x128xf32>
    %219 = math.tanh %218 : vector<8x128xf32>
    %220 = arith.mulf %219, %8 : vector<8x128xf32>
    %221 = arith.addf %220, %11 : vector<8x128xf32>
    %222 = vector.extract_strided_slice %221 {offsets = [0, 0], sizes = [8, 32], strides = [1, 1]} : vector<8x128xf32> to vector<8x32xf32>
    %223 = vector.extract_strided_slice %221 {offsets = [0, 32], sizes = [8, 32], strides = [1, 1]} : vector<8x128xf32> to vector<8x32xf32>
    %224 = vector.extract_strided_slice %221 {offsets = [0, 64], sizes = [8, 32], strides = [1, 1]} : vector<8x128xf32> to vector<8x32xf32>
    %225 = vector.extract_strided_slice %221 {offsets = [0, 96], sizes = [8, 32], strides = [1, 1]} : vector<8x128xf32> to vector<8x32xf32>
    %226 = arith.mulf %223, %187 : vector<8x32xf32>
    %227 = arith.mulf %222, %224 : vector<8x32xf32>
    %228 = arith.addf %226, %227 : vector<8x32xf32>
    %229 = math.tanh %228 : vector<8x32xf32>
    %230 = arith.mulf %225, %229 : vector<8x32xf32>
    %cst_58 = arith.constant dense<0.000000e+00> : vector<8x128xf32>
    %231 = tpu.matmul %230, %13, %cst_58 {dimension_numbers = #tpu.dot_dimension_numbers<[1], [0], [0], [1], [0, 0, 1, 1], [], []>} : vector<8x32xf32>, vector<32x128xf32>, vector<8x128xf32> -> vector<8x128xf32>
    %cst_59 = arith.constant dense<0.000000e+00> : vector<8x128xf32>
    %232 = tpu.matmul %206, %15, %cst_59 {dimension_numbers = #tpu.dot_dimension_numbers<[1], [0], [0], [1], [0, 0, 1, 1], [], []>} : vector<8x32xf32>, vector<32x128xf32>, vector<8x128xf32> -> vector<8x128xf32>
    %233 = arith.addf %231, %232 : vector<8x128xf32>
    %234 = arith.addf %233, %21 : vector<8x128xf32>
    %235 = arith.mulf %234, %8 : vector<8x128xf32>
    %236 = math.tanh %235 : vector<8x128xf32>
    %237 = arith.mulf %236, %8 : vector<8x128xf32>
    %238 = arith.addf %237, %11 : vector<8x128xf32>
    %239 = vector.extract_strided_slice %238 {offsets = [0, 0], sizes = [8, 32], strides = [1, 1]} : vector<8x128xf32> to vector<8x32xf32>
    %240 = vector.extract_strided_slice %238 {offsets = [0, 32], sizes = [8, 32], strides = [1, 1]} : vector<8x128xf32> to vector<8x32xf32>
    %241 = vector.extract_strided_slice %238 {offsets = [0, 64], sizes = [8, 32], strides = [1, 1]} : vector<8x128xf32> to vector<8x32xf32>
    %242 = vector.extract_strided_slice %238 {offsets = [0, 96], sizes = [8, 32], strides = [1, 1]} : vector<8x128xf32> to vector<8x32xf32>
    %243 = arith.mulf %240, %204 : vector<8x32xf32>
    %244 = arith.mulf %239, %241 : vector<8x32xf32>
    %245 = arith.addf %243, %244 : vector<8x32xf32>
    %246 = math.tanh %245 : vector<8x32xf32>
    %247 = arith.mulf %242, %246 : vector<8x32xf32>
    %cst_60 = arith.constant dense<0.000000e+00> : vector<8x128xf32>
    %248 = tpu.matmul %247, %22, %cst_60 {dimension_numbers = #tpu.dot_dimension_numbers<[1], [0], [0], [1], [0, 0, 1, 1], [], []>} : vector<8x32xf32>, vector<32x128xf32>, vector<8x128xf32> -> vector<8x128xf32>
    %249 = arith.addf %248, %25 : vector<8x128xf32>
    %c1_61 = arith.constant 1 : index
    %c0_62 = arith.constant 0 : index
    %c0_63 = arith.constant 0 : index
    %250 = vector.load %arg10[%c1_61, %c0_62, %c0_63] : memref<4x8x128xf32, #tpu.memory_space<vmem>>, vector<1x8x128xf32>
    %251 = vector.shape_cast %250 : vector<1x8x128xf32> to vector<8x128xf32>
    %252 = vector.shape_cast %249 : vector<8x128xf32> to vector<1x8x128xf32>
    tpu.vector_store %arg10[%c1_61, %c0_62, %c0_63], %252 {strides = array<i32>} : memref<4x8x128xf32, #tpu.memory_space<vmem>>, vector<1x8x128xf32>,
    %c6 = arith.constant 6 : index
    %c0_64 = arith.constant 0 : index
    %c0_65 = arith.constant 0 : index
    %253 = vector.load %arg1[%c6, %c0_64, %c0_65] : memref<8x8x4xf32, #tpu.memory_space<vmem>>, vector<1x8x4xf32>
    %254 = vector.shape_cast %253 : vector<1x8x4xf32> to vector<8x4xf32>
    %cst_66 = arith.constant dense<0.000000e+00> : vector<8x128xf32>
    %255 = tpu.matmul %254, %12, %cst_66 {dimension_numbers = #tpu.dot_dimension_numbers<[1], [0], [0], [1], [0, 0, 1, 1], [], []>} : vector<8x4xf32>, vector<4x128xf32>, vector<8x128xf32> -> vector<8x128xf32>
    %cst_67 = arith.constant dense<0.000000e+00> : vector<8x128xf32>
    %256 = tpu.matmul %230, %14, %cst_67 {dimension_numbers = #tpu.dot_dimension_numbers<[1], [0], [0], [1], [0, 0, 1, 1], [], []>} : vector<8x32xf32>, vector<32x128xf32>, vector<8x128xf32> -> vector<8x128xf32>
    %257 = arith.addf %255, %256 : vector<8x128xf32>
    %258 = arith.addf %257, %18 : vector<8x128xf32>
    %259 = arith.mulf %258, %8 : vector<8x128xf32>
    %260 = math.tanh %259 : vector<8x128xf32>
    %261 = arith.mulf %260, %8 : vector<8x128xf32>
    %262 = arith.addf %261, %11 : vector<8x128xf32>
    %263 = vector.extract_strided_slice %262 {offsets = [0, 0], sizes = [8, 32], strides = [1, 1]} : vector<8x128xf32> to vector<8x32xf32>
    %264 = vector.extract_strided_slice %262 {offsets = [0, 32], sizes = [8, 32], strides = [1, 1]} : vector<8x128xf32> to vector<8x32xf32>
    %265 = vector.extract_strided_slice %262 {offsets = [0, 64], sizes = [8, 32], strides = [1, 1]} : vector<8x128xf32> to vector<8x32xf32>
    %266 = vector.extract_strided_slice %262 {offsets = [0, 96], sizes = [8, 32], strides = [1, 1]} : vector<8x128xf32> to vector<8x32xf32>
    %267 = arith.mulf %264, %228 : vector<8x32xf32>
    %268 = arith.mulf %263, %265 : vector<8x32xf32>
    %269 = arith.addf %267, %268 : vector<8x32xf32>
    %270 = math.tanh %269 : vector<8x32xf32>
    %271 = arith.mulf %266, %270 : vector<8x32xf32>
    %cst_68 = arith.constant dense<0.000000e+00> : vector<8x128xf32>
    %272 = tpu.matmul %271, %13, %cst_68 {dimension_numbers = #tpu.dot_dimension_numbers<[1], [0], [0], [1], [0, 0, 1, 1], [], []>} : vector<8x32xf32>, vector<32x128xf32>, vector<8x128xf32> -> vector<8x128xf32>
    %cst_69 = arith.constant dense<0.000000e+00> : vector<8x128xf32>
    %273 = tpu.matmul %247, %15, %cst_69 {dimension_numbers = #tpu.dot_dimension_numbers<[1], [0], [0], [1], [0, 0, 1, 1], [], []>} : vector<8x32xf32>, vector<32x128xf32>, vector<8x128xf32> -> vector<8x128xf32>
    %274 = arith.addf %272, %273 : vector<8x128xf32>
    %275 = arith.addf %274, %21 : vector<8x128xf32>
    %276 = arith.mulf %275, %8 : vector<8x128xf32>
    %277 = math.tanh %276 : vector<8x128xf32>
    %278 = arith.mulf %277, %8 : vector<8x128xf32>
    %279 = arith.addf %278, %11 : vector<8x128xf32>
    %280 = vector.extract_strided_slice %279 {offsets = [0, 0], sizes = [8, 32], strides = [1, 1]} : vector<8x128xf32> to vector<8x32xf32>
    %281 = vector.extract_strided_slice %279 {offsets = [0, 32], sizes = [8, 32], strides = [1, 1]} : vector<8x128xf32> to vector<8x32xf32>
    %282 = vector.extract_strided_slice %279 {offsets = [0, 64], sizes = [8, 32], strides = [1, 1]} : vector<8x128xf32> to vector<8x32xf32>
    %283 = vector.extract_strided_slice %279 {offsets = [0, 96], sizes = [8, 32], strides = [1, 1]} : vector<8x128xf32> to vector<8x32xf32>
    %284 = arith.mulf %281, %245 : vector<8x32xf32>
    %285 = arith.mulf %280, %282 : vector<8x32xf32>
    %286 = arith.addf %284, %285 : vector<8x32xf32>
    %287 = math.tanh %286 : vector<8x32xf32>
    %288 = arith.mulf %283, %287 : vector<8x32xf32>
    %cst_70 = arith.constant dense<0.000000e+00> : vector<8x128xf32>
    %289 = tpu.matmul %288, %22, %cst_70 {dimension_numbers = #tpu.dot_dimension_numbers<[1], [0], [0], [1], [0, 0, 1, 1], [], []>} : vector<8x32xf32>, vector<32x128xf32>, vector<8x128xf32> -> vector<8x128xf32>
    %290 = arith.addf %289, %25 : vector<8x128xf32>
    %c2_71 = arith.constant 2 : index
    %c0_72 = arith.constant 0 : index
    %c0_73 = arith.constant 0 : index
    %291 = vector.load %arg10[%c2_71, %c0_72, %c0_73] : memref<4x8x128xf32, #tpu.memory_space<vmem>>, vector<1x8x128xf32>
    %292 = vector.shape_cast %291 : vector<1x8x128xf32> to vector<8x128xf32>
    %293 = vector.shape_cast %290 : vector<8x128xf32> to vector<1x8x128xf32>
    tpu.vector_store %arg10[%c2_71, %c0_72, %c0_73], %293 {strides = array<i32>} : memref<4x8x128xf32, #tpu.memory_space<vmem>>, vector<1x8x128xf32>,
    %c7 = arith.constant 7 : index
    %c0_74 = arith.constant 0 : index
    %c0_75 = arith.constant 0 : index
    %294 = vector.load %arg1[%c7, %c0_74, %c0_75] : memref<8x8x4xf32, #tpu.memory_space<vmem>>, vector<1x8x4xf32>
    %295 = vector.shape_cast %294 : vector<1x8x4xf32> to vector<8x4xf32>
    %cst_76 = arith.constant dense<0.000000e+00> : vector<8x128xf32>
    %296 = tpu.matmul %295, %12, %cst_76 {dimension_numbers = #tpu.dot_dimension_numbers<[1], [0], [0], [1], [0, 0, 1, 1], [], []>} : vector<8x4xf32>, vector<4x128xf32>, vector<8x128xf32> -> vector<8x128xf32>
    %cst_77 = arith.constant dense<0.000000e+00> : vector<8x128xf32>
    %297 = tpu.matmul %271, %14, %cst_77 {dimension_numbers = #tpu.dot_dimension_numbers<[1], [0], [0], [1], [0, 0, 1, 1], [], []>} : vector<8x32xf32>, vector<32x128xf32>, vector<8x128xf32> -> vector<8x128xf32>
    %298 = arith.addf %296, %297 : vector<8x128xf32>
    %299 = arith.addf %298, %18 : vector<8x128xf32>
    %300 = arith.mulf %299, %8 : vector<8x128xf32>
    %301 = math.tanh %300 : vector<8x128xf32>
    %302 = arith.mulf %301, %8 : vector<8x128xf32>
    %303 = arith.addf %302, %11 : vector<8x128xf32>
    %304 = vector.extract_strided_slice %303 {offsets = [0, 0], sizes = [8, 32], strides = [1, 1]} : vector<8x128xf32> to vector<8x32xf32>
    %305 = vector.extract_strided_slice %303 {offsets = [0, 32], sizes = [8, 32], strides = [1, 1]} : vector<8x128xf32> to vector<8x32xf32>
    %306 = vector.extract_strided_slice %303 {offsets = [0, 64], sizes = [8, 32], strides = [1, 1]} : vector<8x128xf32> to vector<8x32xf32>
    %307 = vector.extract_strided_slice %303 {offsets = [0, 96], sizes = [8, 32], strides = [1, 1]} : vector<8x128xf32> to vector<8x32xf32>
    %308 = arith.mulf %305, %269 : vector<8x32xf32>
    %309 = arith.mulf %304, %306 : vector<8x32xf32>
    %310 = arith.addf %308, %309 : vector<8x32xf32>
    %311 = math.tanh %310 : vector<8x32xf32>
    %312 = arith.mulf %307, %311 : vector<8x32xf32>
    %cst_78 = arith.constant dense<0.000000e+00> : vector<8x128xf32>
    %313 = tpu.matmul %312, %13, %cst_78 {dimension_numbers = #tpu.dot_dimension_numbers<[1], [0], [0], [1], [0, 0, 1, 1], [], []>} : vector<8x32xf32>, vector<32x128xf32>, vector<8x128xf32> -> vector<8x128xf32>
    %cst_79 = arith.constant dense<0.000000e+00> : vector<8x128xf32>
    %314 = tpu.matmul %288, %15, %cst_79 {dimension_numbers = #tpu.dot_dimension_numbers<[1], [0], [0], [1], [0, 0, 1, 1], [], []>} : vector<8x32xf32>, vector<32x128xf32>, vector<8x128xf32> -> vector<8x128xf32>
    %315 = arith.addf %313, %314 : vector<8x128xf32>
    %316 = arith.addf %315, %21 : vector<8x128xf32>
    %317 = arith.mulf %316, %8 : vector<8x128xf32>
    %318 = math.tanh %317 : vector<8x128xf32>
    %319 = arith.mulf %318, %8 : vector<8x128xf32>
    %320 = arith.addf %319, %11 : vector<8x128xf32>
    %321 = vector.extract_strided_slice %320 {offsets = [0, 0], sizes = [8, 32], strides = [1, 1]} : vector<8x128xf32> to vector<8x32xf32>
    %322 = vector.extract_strided_slice %320 {offsets = [0, 32], sizes = [8, 32], strides = [1, 1]} : vector<8x128xf32> to vector<8x32xf32>
    %323 = vector.extract_strided_slice %320 {offsets = [0, 64], sizes = [8, 32], strides = [1, 1]} : vector<8x128xf32> to vector<8x32xf32>
    %324 = vector.extract_strided_slice %320 {offsets = [0, 96], sizes = [8, 32], strides = [1, 1]} : vector<8x128xf32> to vector<8x32xf32>
    %325 = arith.mulf %322, %286 : vector<8x32xf32>
    %326 = arith.mulf %321, %323 : vector<8x32xf32>
    %327 = arith.addf %325, %326 : vector<8x32xf32>
    %328 = math.tanh %327 : vector<8x32xf32>
    %329 = arith.mulf %324, %328 : vector<8x32xf32>
    %cst_80 = arith.constant dense<0.000000e+00> : vector<8x128xf32>
    %330 = tpu.matmul %329, %22, %cst_80 {dimension_numbers = #tpu.dot_dimension_numbers<[1], [0], [0], [1], [0, 0, 1, 1], [], []>} : vector<8x32xf32>, vector<32x128xf32>, vector<8x128xf32> -> vector<8x128xf32>
    %331 = arith.addf %330, %25 : vector<8x128xf32>
    %c3_81 = arith.constant 3 : index
    %c0_82 = arith.constant 0 : index
    %c0_83 = arith.constant 0 : index
    %332 = vector.load %arg10[%c3_81, %c0_82, %c0_83] : memref<4x8x128xf32, #tpu.memory_space<vmem>>, vector<1x8x128xf32>
    %333 = vector.shape_cast %332 : vector<1x8x128xf32> to vector<8x128xf32>
    %334 = vector.shape_cast %331 : vector<8x128xf32> to vector<1x8x128xf32>
    tpu.vector_store %arg10[%c3_81, %c0_82, %c0_83], %334 {strides = array<i32>} : memref<4x8x128xf32, #tpu.memory_space<vmem>>, vector<1x8x128xf32>,
    return
  }
  func.func @transform_0(%arg0: i32) -> (i32, i32, i32) {
    %c0_i32 = arith.constant 0 : i32
    %c0_i32_0 = arith.constant 0 : i32
    %c0_i32_1 = arith.constant 0 : i32
    return %c0_i32, %arg0, %c0_i32_0 : i32, i32, i32
  }
  func.func @transform_1(%arg0: i32) -> (i32, i32) {
    %c0_i32 = arith.constant 0 : i32
    %c0_i32_0 = arith.constant 0 : i32
    %c0_i32_1 = arith.constant 0 : i32
    return %c0_i32, %c0_i32_0 : i32, i32
  }
  func.func @transform_2(%arg0: i32) -> (i32, i32) {
    %c0_i32 = arith.constant 0 : i32
    %c0_i32_0 = arith.constant 0 : i32
    %c0_i32_1 = arith.constant 0 : i32
    return %c0_i32, %c0_i32_0 : i32, i32
  }
  func.func @transform_3(%arg0: i32) -> (i32, i32) {
    %c0_i32 = arith.constant 0 : i32
    %c0_i32_0 = arith.constant 0 : i32
    %c0_i32_1 = arith.constant 0 : i32
    return %c0_i32, %c0_i32_0 : i32, i32
  }
  func.func @transform_4(%arg0: i32) -> (i32, i32) {
    %c0_i32 = arith.constant 0 : i32
    %c0_i32_0 = arith.constant 0 : i32
    %c0_i32_1 = arith.constant 0 : i32
    return %c0_i32, %c0_i32_0 : i32, i32
  }
  func.func @transform_5(%arg0: i32) -> (i32, i32) {
    %c0_i32 = arith.constant 0 : i32
    %c0_i32_0 = arith.constant 0 : i32
    %c0_i32_1 = arith.constant 0 : i32
    return %c0_i32, %c0_i32_0 : i32, i32
  }
  func.func @transform_6(%arg0: i32) -> (i32, i32) {
    %c0_i32 = arith.constant 0 : i32
    %c0_i32_0 = arith.constant 0 : i32
    %c0_i32_1 = arith.constant 0 : i32
    return %c0_i32, %c0_i32_0 : i32, i32
  }
  func.func @transform_7(%arg0: i32) -> (i32, i32) {
    %c0_i32 = arith.constant 0 : i32
    %c0_i32_0 = arith.constant 0 : i32
    %c0_i32_1 = arith.constant 0 : i32
    return %c0_i32, %c0_i32_0 : i32, i32
  }
  func.func @transform_8(%arg0: i32) -> (i32, i32) {
    %c0_i32 = arith.constant 0 : i32
    %c0_i32_0 = arith.constant 0 : i32
    %c0_i32_1 = arith.constant 0 : i32
    return %c0_i32, %c0_i32_0 : i32, i32
  }
  func.func @transform_9(%arg0: i32) -> (i32, i32, i32) {
    %c0_i32 = arith.constant 0 : i32
    %c0_i32_0 = arith.constant 0 : i32
    %c0_i32_1 = arith.constant 0 : i32
    return %c0_i32, %arg0, %c0_i32_0 : i32, i32, i32
  }
}

</mosaic_0001>

<bundles_post_ra>
// kernel: lstm_model_forward.1
= control target key start
LH: loop header
LB: loop body
LE: loop exit
PB: predicated region body
PF: predicated region fallthrough
CT: control target
= control target key end

     0   :  { %14 = vsyncpa [#allocation3], 0  ;;  %s4928_s0 = inlined_call_operand.hbm [shape: f32[8,8,4], index: 0, kind: input, shape index: {}]   ;;  %s4929_s1 = inlined_call_operand.hbm [shape: f32[4,128], index: 1, kind: input, shape index: {}]   ;;  %s4930_s2 = inlined_call_operand.hbm [shape: f32[32,128], index: 2, kind: input, shape index: {}]   ;;  %s4931_s3 = inlined_call_operand.hbm [shape: f32[1,128], index: 3, kind: input, shape index: {}]   ;;  %s4932_s4 = inlined_call_operand.hbm [shape: f32[32,128], index: 4, kind: input, shape index: {}]   ;;  %s4933_s5 = inlined_call_operand.hbm [shape: f32[32,128], index: 5, kind: input, shape index: {}]   ;;  %s4934_s6 = inlined_call_operand.hbm [shape: f32[1,128], index: 6, kind: input, shape index: {}]   ;;  %s4935_s7 = inlined_call_operand.hbm [shape: f32[32,128], index: 7, kind: input, shape index: {}]   ;;  %s4936_s8 = inlined_call_operand.hbm [shape: f32[1,128], index: 8, kind: input, shape index: {}]   ;;  %s4937_s9 = inlined_call_operand.hbm [shape: f32[4,8,128], index: 9, kind: output, shape index: {}]  }
   0x1   :  { %15 = vsyncpa [#allocation6], 0 }
   0x2   :  { %16 = vsyncpa [#allocation9], 0 }
   0x3   :  { %17 = vsyncpa [#allocation12], 0 }
   0x4   :  { %18 = vsyncpa [#allocation15], 0 }
   0x5   :  { %19 = vsyncpa [#allocation4], 0  ;;  %s4254_s30 = smov [#allocation5]   ;;  %s4255_s11 = smov [#allocation8]  }
   0x6   :  { %s38_s10 = sshll.u32 %s4254_s30, 4  ;;  %s60_s12 = sshll.u32 %s4255_s11, 4  ;;  %s39_s10 = int_to_ptr.vmem [resolvable:$true] %s38_s10  ;;  %s61_s12 = int_to_ptr.vmem [resolvable:$true] %s60_s12 }
   0x7   :  { %s4022_s15 = scalar_lea.hbm %s4929_s1, 64 }
   0x8   :  { %p4023_p0 = scmp.ne.s32.totalorder %s4929_s1, %s4022_s15  ;;  %p4026_p1 = scmp.lt.u32.totalorder %s4022_s15, %s4929_s1 }
   0xa   :  { %p4028_p2 = pnand %p4026_p1, %p4023_p0 }
   0xc   :  { %4031 = shalt.err (!%p4028_p2)
}
   0xd   :  { %s4032_s20 = scalar_lea.vmem %s39_s10, 64  ;;  %p4037_p4 = scmp.lt.s32.totalorder %s39_s10, %s39_s10 }
   0xe   :  { %p4033_p3 = scmp.ne.s32.totalorder %s39_s10, %s4032_s20  ;;  %p4038_p5 = scmp.lt.s32.totalorder %s4032_s20, %s4032_s20 }
  0x10   :  { %p4039_p6 = por %p4038_p5, %p4037_p4 }
  0x12   :  { %p4040_p7 = pnand %p4039_p6, %p4033_p3 }
  0x14   :  { %4043 = shalt.err (!%p4040_p7)
}
  0x15   :  { %41 = dma.hbm_to_vmem [thread:$0]  %s4929_s1, 64, %s39_s10, [#allocation6]  }
  0x16   :  { %s4044_s25 = scalar_lea.hbm %s4931_s3, 16 }
  0x17   :  { %p4045_p8 = scmp.ne.s32.totalorder %s4931_s3, %s4044_s25  ;;  %p4048_p9 = scmp.lt.u32.totalorder %s4044_s25, %s4931_s3 }
  0x19   :  { %p4050_p10 = pnand %p4048_p9, %p4045_p8 }
  0x1b   :  { %4053 = shalt.err (!%p4050_p10)
}
  0x1c   :  { %s4054_s30 = scalar_lea.vmem %s61_s12, 16  ;;  %s4058_s11 = scalar_lea.vmem %s61_s12, 32 }
  0x1d   :  { %p4055_p11 = scmp.ne.s32.totalorder %s61_s12, %s4054_s30  ;;  %p4059_p12 = scmp.lt.s32.totalorder %s61_s12, %s61_s12 }
  0x1e   :  { %p4060_p13 = scmp.lt.s32.totalorder %s4058_s11, %s4054_s30 }
  0x20   :  { %p4061_p0 = por %p4060_p13, %p4059_p12 }
  0x22   :  { %p4062_p1 = pnand %p4061_p0, %p4055_p11 }
  0x24   :  { %4065 = shalt.err (!%p4062_p1)
}
  0x25   :  { %63 = dma.hbm_to_vmem [thread:$0]  %s4931_s3, 16, %s61_s12, [#allocation9]  }
  0x26   :  { %s4256_s13 = smov [#allocation11]   ;;  %s4257_s15 = smov [#allocation14]  }
  0x27   :  { %s81_s14 = sshll.u32 %s4256_s13, 4  ;;  %s103_s16 = sshll.u32 %s4257_s15, 4  ;;  %s82_s14 = int_to_ptr.vmem [resolvable:$true] %s81_s14  ;;  %s4346_s16 = int_to_ptr.vmem [resolvable:$true] %s103_s16 }
  0x28   :  { %s4066_s19 = scalar_lea.hbm %s4933_s5, 512 }
  0x29   :  { %p4067_p2 = scmp.ne.s32.totalorder %s4933_s5, %s4066_s19  ;;  %p4070_p3 = scmp.lt.u32.totalorder %s4066_s19, %s4933_s5 }
  0x2b   :  { %p4072_p4 = pnand %p4070_p3, %p4067_p2 }
  0x2d   :  { %4075 = shalt.err (!%p4072_p4)
}
  0x2e   :  { %s4076_s3 = scalar_lea.vmem %s82_s14, 512  ;;  %p4081_p6 = scmp.lt.s32.totalorder %s82_s14, %s82_s14 }
  0x2f   :  { %p4077_p5 = scmp.ne.s32.totalorder %s82_s14, %s4076_s3  ;;  %p4082_p7 = scmp.lt.s32.totalorder %s4076_s3, %s4076_s3 }
  0x31   :  { %p4083_p8 = por %p4082_p7, %p4081_p6 }
  0x33   :  { %p4084_p9 = pnand %p4083_p8, %p4077_p5 }
  0x35   :  { %4087 = shalt.err (!%p4084_p9)
}
  0x36   :  { %s4258_s12 = smov 128   ;;  %s4259_s24 = smov 8  }
  0x37   :  { %87 = dma.hbm_to_vmem [thread:$0]  %s4933_s5, 512, %s82_s14, [#allocation12], %s4258_s12, %s4258_s12, %s4259_s24  }
  0x38   :  { %s4088_s29 = scalar_lea.hbm %s4935_s7, 512 }
  0x39   :  { %p4089_p10 = scmp.ne.s32.totalorder %s4935_s7, %s4088_s29  ;;  %p4092_p11 = scmp.lt.u32.totalorder %s4088_s29, %s4935_s7 }
  0x3b   :  { %p4094_p12 = pnand %p4092_p11, %p4089_p10 }
  0x3d   :  { %4097 = shalt.err (!%p4094_p12)
}
  0x3e   :  { %s4098_s13 = scalar_lea.vmem %s4346_s16, 512  ;;  %p4103_p0 = scmp.lt.s32.totalorder %s4346_s16, %s4346_s16 }
  0x3f   :  { %p4099_p13 = scmp.ne.s32.totalorder %s4346_s16, %s4098_s13  ;;  %p4104_p1 = scmp.lt.s32.totalorder %s4098_s13, %s4098_s13 }
  0x41   :  { %p4105_p2 = por %p4104_p1, %p4103_p0 }
  0x43   :  { %p4106_p3 = pnand %p4105_p2, %p4099_p13 }
  0x45   :  { %4109 = shalt.err (!%p4106_p3)
}
  0x46   :  { %109 = dma.hbm_to_vmem [thread:$0]  %s4935_s7, 512, %s4346_s16, [#allocation15], %s4258_s12, %s4258_s12, %s4259_s24  }
  0x47   :  { %s4260_s15 = smov [#allocation2]   ;;  %s4261_s18 = smov [#allocation7]  }
  0x48   :  { %s25_s17 = sshll.u32 %s4260_s15, 4  ;;  %s47_s19 = sshll.u32 %s4261_s18, 4  ;;  %s26_s17 = int_to_ptr.vmem [resolvable:$true] %s25_s17  ;;  %s4383_s19 = int_to_ptr.vmem [resolvable:$true] %s47_s19 }
  0x49   :  { %s4110_s22 = scalar_lea.hbm %s4928_s0, 1024 }
  0x4a   :  { %p4111_p4 = scmp.ne.s32.totalorder %s4928_s0, %s4110_s22  ;;  %p4114_p5 = scmp.lt.u32.totalorder %s4110_s22, %s4928_s0 }
  0x4c   :  { %p4116_p6 = pnand %p4114_p5, %p4111_p4 }
  0x4e   :  { %4119 = shalt.err (!%p4116_p6)
}
  0x4f   :  { %s4120_s7 = scalar_lea.vmem %s26_s17, 1024  ;;  %p4125_p8 = scmp.lt.s32.totalorder %s26_s17, %s26_s17 }
  0x50   :  { %p4121_p7 = scmp.ne.s32.totalorder %s26_s17, %s4120_s7  ;;  %p4126_p9 = scmp.lt.s32.totalorder %s4120_s7, %s4120_s7 }
  0x52   :  { %p4127_p10 = por %p4126_p9, %p4125_p8 }
  0x54   :  { %p4128_p11 = pnand %p4127_p10, %p4121_p7 }
  0x56   :  { %4131 = shalt.err (!%p4128_p11)
}
  0x57   :  { %31 = dma.hbm_to_vmem [thread:$0]  %s4928_s0, 1024, %s26_s17, [#allocation3], %s4258_s12, %s4258_s12, %s4259_s24  }
  0x58   :  { %s4132_s30 = scalar_lea.hbm %s4930_s2, 512 }
  0x59   :  { %p4133_p12 = scmp.ne.s32.totalorder %s4930_s2, %s4132_s30  ;;  %p4136_p13 = scmp.lt.u32.totalorder %s4132_s30, %s4930_s2 }
  0x5b   :  { %p4138_p0 = pnand %p4136_p13, %p4133_p12 }
  0x5d   :  { %4141 = shalt.err (!%p4138_p0)
}
  0x5e   :  { %s4142_s5 = scalar_lea.vmem %s4383_s19, 512  ;;  %p4147_p2 = scmp.lt.s32.totalorder %s4383_s19, %s4383_s19 }
  0x5f   :  { %p4143_p1 = scmp.ne.s32.totalorder %s4383_s19, %s4142_s5  ;;  %p4148_p3 = scmp.lt.s32.totalorder %s4142_s5, %s4142_s5 }
  0x61   :  { %p4149_p4 = por %p4148_p3, %p4147_p2 }
  0x63   :  { %p4150_p5 = pnand %p4149_p4, %p4143_p1 }
  0x65   :  { %4153 = shalt.err (!%p4150_p5)
}
  0x66   :  { %53 = dma.hbm_to_vmem [thread:$0]  %s4930_s2, 512, %s4383_s19, [#allocation6], %s4258_s12, %s4258_s12, %s4259_s24  }
  0x67   :  { %s4262_s15 = smov [#allocation10]   ;;  %s4263_s18 = smov [#allocation13]  }
  0x68   :  { %s69_s17 = sshll.u32 %s4262_s15, 4  ;;  %s94_s20 = sshll.u32 %s4263_s18, 4  ;;  %s70_s17 = int_to_ptr.vmem [resolvable:$true] %s69_s17  ;;  %s95_s20 = int_to_ptr.vmem [resolvable:$true] %s94_s20 }
  0x69   :  { %s4154_s23 = scalar_lea.hbm %s4932_s4, 512 }
  0x6a   :  { %p4155_p6 = scmp.ne.s32.totalorder %s4932_s4, %s4154_s23  ;;  %p4158_p7 = scmp.lt.u32.totalorder %s4154_s23, %s4932_s4 }
  0x6c   :  { %p4160_p8 = pnand %p4158_p7, %p4155_p6 }
  0x6e   :  { %4163 = shalt.err (!%p4160_p8)
}
  0x6f   :  { %s4164_s2 = scalar_lea.vmem %s70_s17, 512  ;;  %p4169_p10 = scmp.lt.s32.totalorder %s70_s17, %s70_s17 }
  0x70   :  { %p4165_p9 = scmp.ne.s32.totalorder %s70_s17, %s4164_s2  ;;  %p4170_p11 = scmp.lt.s32.totalorder %s4164_s2, %s4164_s2 }
  0x72   :  { %p4171_p12 = por %p4170_p11, %p4169_p10 }
  0x74   :  { %p4172_p13 = pnand %p4171_p12, %p4165_p9 }
  0x76   :  { %4175 = shalt.err (!%p4172_p13)
}
  0x77   :  { %75 = dma.hbm_to_vmem [thread:$0]  %s4932_s4, 512, %s70_s17, [#allocation9], %s4258_s12, %s4258_s12, %s4259_s24  }
  0x78   :  { %s4176_s29 = scalar_lea.hbm %s4934_s6, 16 }
  0x79   :  { %p4177_p0 = scmp.ne.s32.totalorder %s4934_s6, %s4176_s29  ;;  %p4180_p1 = scmp.lt.u32.totalorder %s4176_s29, %s4934_s6 }
  0x7b   :  { %p4182_p2 = pnand %p4180_p1, %p4177_p0 }
  0x7d   :  { %4185 = shalt.err (!%p4182_p2)
}
  0x7e   :  { %s4186_s13 = scalar_lea.vmem %s95_s20, 16  ;;  %s4190_s5 = scalar_lea.vmem %s95_s20, 32 }
  0x7f   :  { %p4187_p3 = scmp.ne.s32.totalorder %s95_s20, %s4186_s13  ;;  %p4191_p4 = scmp.lt.s32.totalorder %s95_s20, %s95_s20 }
  0x80   :  { %p4192_p5 = scmp.lt.s32.totalorder %s4190_s5, %s4186_s13 }
  0x82   :  { %p4193_p6 = por %p4192_p5, %p4191_p4 }
  0x84   :  { %p4194_p7 = pnand %p4193_p6, %p4187_p3 }
  0x86   :  { %4197 = shalt.err (!%p4194_p7)
}
  0x87   :  { %97 = dma.hbm_to_vmem [thread:$0]  %s4934_s6, 16, %s95_s20, [#allocation12]  }
  0x88   :  { %s4264_s14 = smov [#allocation16]   ;;  %s4198_s21 = scalar_lea.hbm %s4936_s8, 16 }
  0x89   :  { %s116_s15 = sshll.u32 %s4264_s14, 4  ;;  %p4199_p8 = scmp.ne.s32.totalorder %s4936_s8, %s4198_s21  ;;  %s117_s15 = int_to_ptr.vmem [resolvable:$true] %s116_s15 }
  0x8a   :  { %p4202_p9 = scmp.lt.u32.totalorder %s4198_s21, %s4936_s8 }
  0x8c   :  { %p4204_p10 = pnand %p4202_p9, %p4199_p8 }
  0x8e   :  { %4207 = shalt.err (!%p4204_p10)
}
  0x8f   :  { %s4208_s26 = scalar_lea.vmem %s117_s15, 16  ;;  %s4212_s6 = scalar_lea.vmem %s117_s15, 32 }
  0x90   :  { %p4209_p11 = scmp.ne.s32.totalorder %s117_s15, %s4208_s26  ;;  %p4213_p12 = scmp.lt.s32.totalorder %s117_s15, %s117_s15 }
  0x91   :  { %p4214_p13 = scmp.lt.s32.totalorder %s4212_s6, %s4208_s26 }
  0x93   :  { %p4215_p0 = por %p4214_p13, %p4213_p12 }
  0x95   :  { %p4216_p1 = pnand %p4215_p0, %p4209_p11 }
  0x97   :  { %4219 = shalt.err (!%p4216_p1)
}
  0x98   :  { %119 = dma.hbm_to_vmem [thread:$0]  %s4936_s8, 16, %s117_s15, [#allocation15]  }
  0x99   :  { %4242 = dma.done.wait [#allocation3], 1024  }
  0x9a   :  { %4243 = vsyncadd [#allocation3], 4294966272 }
  0x9b   :  { %4244 = dma.done.wait [#allocation6], 576  }
  0x9c   :  { %4245 = vsyncadd [#allocation6], 4294966720 }
  0x9d   :  { %4246 = dma.done.wait [#allocation9], 528  }
  0x9e   :  { %4247 = vsyncadd [#allocation9], 4294966768 }
  0x9f   :  { %4248 = dma.done.wait [#allocation12], 528  }
  0xa0   :  { %4249 = vsyncadd [#allocation12], 4294966768 }
  0xa1   :  { %4250 = dma.done.wait [#allocation15], 528  }
  0xa2   :  { %4251 = vsyncadd [#allocation15], 4294966768  ;;  %v4265_v0 = vmov 0.0|0.0   ;;  %vm4266_vm0 = vmmov 0   ;;  %v4267_v1 = vmov 0.0   ;;  %v159_v2 = vld [vmem:[#allocation7] sm:$0xff]  ;;  %v147_v10 = vlaneseq }
  0xa3   :  { %3769 = vmatprep.subr.bf16.mxu0 %v4265_v0  ;;  %3429 = vmatprep.mubr.msk.f32.mxu0 %vm4266_vm0, %v4267_v1  ;;  %v160_v3 = vld [vmem:[#allocation7 + $0x8] sm:$0xff]  ;;  %v161_v4 = vld [vmem:[#allocation7 + $0x10] sm:$0xff]  ;;  %v162_v6 = vld [vmem:[#allocation7 + $0x18] sm:$0xff]  ;;  %vm271_vm1 = vcmask 1043456   ;;  %vm267_vm2 = vcmask 31744   ;;  %v4268_v18 = vmov 1.0  }
  0xa4   :  { %3775 = vmatprep.subr.bf16.mxu1 %v4265_v0  ;;  %3445 = vmatprep.mubr.msk.f32.mxu1 %vm4266_vm0, %v4267_v1  ;;  %v4465_v5 = vpack.c.bf16 %v160_v3, %v159_v2  ;;  %v4468_v7 = vpack.c.bf16 %v162_v6, %v161_v4  ;;  %v4473_v8 = vld [vmem:[#allocation5] sm:$0xf]  ;;  %v148_v11 = vand.u32 127, %v147_v10  ;;  %v4484_v14 = vld [vmem:[#allocation8] ss:$0 sm:$0xff]  ;;  %s4269_s8 = smov 64  }
  0xa5   :  { %v192_v9 = vld [vmem:[#allocation2] sm:$0xff]  ;;  %s4270_s2 = smov 32   ;;  %v164_v32 = vld [vmem:[#allocation11 + $0x8] sm:$0xff]  ;;  %v165_v33 = vld [vmem:[#allocation11 + $0x10] sm:$0xff]  ;;  %vm193_vm6 = vcmask 261120   ;;  %s4271_s19 = smov [#allocation17]  }
  0xa6   :  { %3771 = vmatpush3.bf16.msra.mxu0 %v4465_v5  ;;  %vm149_vm3 = vcmp.lt.s32.totalorder %v148_v11, 64  ;;  %vm150_vm4 = vcmp.ge.s32.totalorder %v148_v11, 96  ;;  %v163_v31 = vld [vmem:[#allocation11] sm:$0xff]  ;;  %v166_v35 = vld [vmem:[#allocation11 + $0x18] sm:$0xff]  ;;  %v156_v37 = vld [vmem:[#allocation10 + $0x8] sm:$0xff]  ;;  %s3204_s16 = sshll.u32 %s4271_s19, 4  ;;  %s3205_s16 = int_to_ptr.vmem [resolvable:$true] %s3204_s16 }
  0xa7   :  { %3772 = vmatprep.subr.bf16.mxu0 %v4265_v0  ;;  %vm151_vm5 = vmor %vm149_vm3, %vm150_vm4  ;;  %v4500_v34 = vpack.c.bf16 %v164_v32, %v163_v31  ;;  %v155_v36 = vld [vmem:[#allocation10] sm:$0xff]  ;;  %v157_v39 = vld [vmem:[#allocation10 + $0x10] sm:$0xff]  ;;  %v4505_v41 = vpack.c.bf16 %v166_v35, %v165_v33  ;;  %s4220_s27 = scalar_lea.vmem %s3205_s16, 512  ;;  %p4225_p3 = scmp.lt.s32.totalorder %s3205_s16, %s3205_s16 }
  0xa8   :  { %v4486_v19 = vsel %vm151_vm5, 0.5, %v4268_v18  ;;  %v4491_v23 = vsel %vm151_vm5, 0.5, %v4267_v1  ;;  %v4502_v38 = vpack.c.bf16 %v156_v37, %v155_v36  ;;  %v158_v40 = vld [vmem:[#allocation10 + $0x18] sm:$0xff]  ;;  %v535_v49 = vld [vmem:[#allocation2 + $0x8] sm:$0xff]  ;;  %v4545_v50 = vld [vmem:[#allocation13] ss:$0 sm:$0xff]  ;;  %p4221_p2 = scmp.ne.s32.totalorder %s3205_s16, %s4220_s27  ;;  %p4226_p4 = scmp.lt.s32.totalorder %s4220_s27, %s4220_s27 }
  0xa9   :  { %3777 = vmatpush3.bf16.msra.mxu1 %v4500_v34  ;;  %v4509_v42 = vpack.c.bf16 %v158_v40, %v157_v39  ;;  %v874_v31 = vld [vmem:[#allocation2 + $0x10] sm:$0xff] }
  0xaa   :  { %3774 = vmatpush3.bf16.msra.mxu0 %v4468_v7  ;;  %3778 = vmatprep.subr.bf16.mxu1 %v4265_v0  ;;  %p4227_p5 = por %p4226_p4, %p4225_p3 }
  0xab   :  { %3432 = vmatprep.subr.mxu0 %v4267_v1 }
  0xac   :  { %p4228_p6 = pnand %p4227_p5, %p4221_p2 }
  0xad   :  { %3430 = vmatmul.mubr.f32.vlgmr.msra.gmra.mrb[0].mxu0 %v4267_v1  ;;  %3780 = vmatpush3.bf16.msra.mxu1 %v4505_v41 }
  0xae   :  { %3433 = vmatpush3.msk.msra.mxu0 %vm271_vm1, %v4473_v8  ;;  %3434 = vmatprep.mubr.msk.f32.mxu0 %vm4266_vm0, %v4267_v1 }
  0xaf   :  { %3781 = vmatprep.subr.bf16.mxu0 %v4265_v0  ;;  %3787 = vmatprep.subr.bf16.mxu1 %v4265_v0 }
  0xb0   :  { %3446 = vmatmul.mubr.f32.vlgmr.msra.gmra.mrb[0].mxu1 %v4267_v1 }
  0xb1   :  { %3435 = vmatmul.mubr.msk.f32.vlgmr.msra.gmra.mrb[2].mxu0 %vm267_vm2, %v192_v9  ;;  %3789 = vmatpush3.bf16.msra.mxu1 %v4465_v5 }
  0xb2   :  { %3456 = vmatprep.mubr.msk.f32.mxu0 %vm4266_vm0, %v4267_v1  ;;  %3783 = vmatpush3.bf16.msra.mxu0 %v4502_v38 }
  0xb3   :  { %3784 = vmatprep.subr.bf16.mxu0 %v4265_v0  ;;  %3790 = vmatprep.subr.bf16.mxu1 %v4265_v0 }
  0xb4   :  { %3467 = vmatprep.mubr.msk.f32.mxu1 %vm4266_vm0, %v4267_v1 }
  0xb5   :  { %3792 = vmatpush3.bf16.msra.mxu1 %v4468_v7 }
  0xb6   :  { %3786 = vmatpush3.bf16.msra.mxu0 %v4509_v42  ;;  %3793 = vmatprep.subr.bf16.mxu1 %v4265_v0 }
  0xb7   :  { %3470 = vmatprep.subr.mxu0 %v4267_v1 }
 0x180   :  { %v263_v12 = vpop.f32.mrb[0].mxu0 }
 0x181   :  { %v3431_v13 = vpop.f32.mrb[1].mxu0 }
 0x183   :  { %v433_v46 = vpop.f32.mrb[0].mxu1 }
 0x184   :  { %v341_v15 = vpop.f32.mrb[2].mxu0  ;;  %v3447_v47 = vpop.f32.mrb[1].mxu1 }
 0x185   :  { %v342_v16 = vadd.f32 %v341_v15, %v263_v12  ;;  %v3436_v17 = vpop.f32.mrb[3].mxu0 }
 0x187   :  { %v345_v20 = vadd.f32 %v4484_v14, %v342_v16 }
 0x189   :  { %v346_v21 = vmul.f32 %v345_v20, %v4486_v19 }
 0x18b   :  { %3955 = vtanh.f32 %v346_v21 }
 0x195   :  { %v3956_v22 = vpop.eup %3955 }
 0x196   :  { %v348_v24 = vmul.f32 %v3956_v22, %v4486_v19 }
 0x198   :  { %v349_v25 = vadd.f32 %v348_v24, %v4491_v23 }
 0x19a   :  { %352 = vrot.lane.b32.xlu0 %v349_v25, %s4269_s8  ;;  %v350_v28 = vmul.f32 0.0, %v349_v25 }
 0x20c   :  { %v353_v26 = vpop.permute.xlu0 %352 }
 0x20d   :  { %v355_v27 = vmul.f32 %v353_v26, %v349_v25 }
 0x20f   :  { %357 = vrot.lane.b32.xlu0 %v355_v27, %s4270_s2 }
 0x281   :  { %v358_v29 = vpop.permute.xlu0 %357 }
 0x282   :  { %v4497_v30 = vadd.f32 %v358_v29, %v350_v28 }
 0x284   :  { %3957 = vtanh.f32 %v4497_v30 }
 0x28e   :  { %v3958_v43 = vpop.eup %3957 }
 0x28f   :  { %363 = vrot.lane.b32.xlu1 %v3958_v43, %s4269_s8 }
 0x301   :  { %v364_v44 = vpop.permute.xlu1 %363 }
 0x302   :  { %v366_v45 = vmul.f32 %v364_v44, %v349_v25 }
 0x304   :  { %438 = vrot.lane.b32.xlu1 %v366_v45, %s4270_s2 }
 0x376   :  { %v439_v48 = vpop.permute.xlu1 %438 }
 0x377   :  { %3457 = vmatmul.mubr.msk.f32.vlgmr.msra.gmra.mrb[4].mxu0 %vm193_vm6, %v439_v48  ;;  %3468 = vmatmul.mubr.msk.f32.vlgmr.msra.gmra.mrb[2].mxu1 %vm193_vm6, %v439_v48 }
 0x378   :  { %3471 = vmatpush3.msk.msra.mxu0 %vm271_vm1, %v4473_v8  ;;  %3472 = vmatprep.mubr.msk.f32.mxu0 %vm4266_vm0, %v4267_v1 }
 0x379   :  { %3795 = vmatpush3.bf16.msra.mxu1 %v4500_v34  ;;  %3799 = vmatprep.subr.bf16.mxu0 %v4265_v0 }
 0x37a   :  { %3796 = vmatprep.subr.bf16.mxu1 %v4265_v0  ;;  %3483 = vmatprep.mubr.msk.f32.mxu1 %vm4266_vm0, %v4267_v1 }
 0x37b   :  { %3473 = vmatmul.mubr.msk.f32.vlgmr.msra.gmra.mrb[6].mxu0 %vm267_vm2, %v535_v49 }
 0x37c   :  { %3801 = vmatpush3.bf16.msra.mxu0 %v4502_v38  ;;  %3494 = vmatprep.mubr.msk.f32.mxu0 %vm4266_vm0, %v4267_v1 }
 0x37d   :  { %3798 = vmatpush3.bf16.msra.mxu1 %v4505_v41  ;;  %3802 = vmatprep.subr.bf16.mxu0 %v4265_v0 }
 0x37e   :  { %3805 = vmatprep.subr.bf16.mxu1 %v4265_v0 }
 0x380   :  { %3804 = vmatpush3.bf16.msra.mxu0 %v4509_v42 }
 0x381   :  { %3508 = vmatprep.subr.mxu0 %v4267_v1 }
 0x44a   :  { %v508_v51 = vpop.f32.mrb[4].mxu0  ;;  %v602_v52 = vpop.f32.mrb[2].mxu1 }
 0x44b   :  { %v509_v53 = vadd.f32 %v508_v51, %v433_v46  ;;  %v3458_v54 = vpop.f32.mrb[5].mxu0  ;;  %v3469_v55 = vpop.f32.mrb[3].mxu1 }
 0x44d   :  { %v512_v56 = vadd.f32 %v4545_v50, %v509_v53 }
 0x44e   :  { %v675_v57 = vpop.f32.mrb[6].mxu0 }
 0x44f   :  { %v513_v58 = vmul.f32 %v512_v56, %v4486_v19  ;;  %v676_v59 = vadd.f32 %v675_v57, %v602_v52  ;;  %v3474_v60 = vpop.f32.mrb[7].mxu0 }
 0x451   :  { %3959 = vtanh.f32 %v513_v58  ;;  %v679_v61 = vadd.f32 %v4484_v14, %v676_v59 }
 0x453   :  { %v680_v62 = vmul.f32 %v679_v61, %v4486_v19 }
 0x455   :  { %3961 = vtanh.f32 %v680_v62 }
 0x45b   :  { %v3960_v63 = vpop.eup %3959 }
 0x45c   :  { %v515_v2 = vmul.f32 %v3960_v63, %v4486_v19 }
 0x45e   :  { %v516_v3 = vadd.f32 %v515_v2, %v4491_v23 }
 0x45f   :  { %v3962_v4 = vpop.eup %3961 }
 0x460   :  { %519 = vrot.lane.b32.xlu0 %v516_v3, %s4269_s8  ;;  %v682_v6 = vmul.f32 %v3962_v4, %v4486_v19  ;;  %v517_v15 = vmul.f32 0.0, %v516_v3 }
 0x462   :  { %v683_v9 = vadd.f32 %v682_v6, %v4491_v23 }
 0x464   :  { %686 = vrot.lane.b32.xlu1 %v683_v9, %s4269_s8  ;;  %v684_v18 = vmul.f32 %v683_v9, %v4497_v30 }
 0x4d2   :  { %v520_v10 = vpop.permute.xlu0 %519 }
 0x4d3   :  { %v522_v11 = vmul.f32 %v520_v10, %v516_v3 }
 0x4d5   :  { %524 = vrot.lane.b32.xlu0 %v522_v11, %s4270_s2 }
 0x4d6   :  { %v687_v12 = vpop.permute.xlu1 %686 }
 0x4d7   :  { %v689_v13 = vmul.f32 %v687_v12, %v683_v9 }
 0x4d9   :  { %691 = vrot.lane.b32.xlu1 %v689_v13, %s4270_s2 }
 0x547   :  { %v525_v16 = vpop.permute.xlu0 %524 }
 0x548   :  { %v4559_v17 = vadd.f32 %v525_v16, %v517_v15 }
 0x54a   :  { %3963 = vtanh.f32 %v4559_v17 }
 0x54b   :  { %v692_v20 = vpop.permute.xlu1 %691 }
 0x54c   :  { %v4563_v21 = vadd.f32 %v692_v20, %v684_v18 }
 0x54e   :  { %3965 = vtanh.f32 %v4563_v21 }
 0x554   :  { %v3964_v22 = vpop.eup %3963 }
 0x555   :  { %530 = vrot.lane.b32.xlu0 %v3964_v22, %s4269_s8 }
 0x558   :  { %v3966_v24 = vpop.eup %3965 }
 0x559   :  { %697 = vrot.lane.b32.xlu1 %v3966_v24, %s4269_s8 }
 0x5c7   :  { %v531_v25 = vpop.permute.xlu0 %530 }
 0x5c8   :  { %v533_v26 = vmul.f32 %v531_v25, %v516_v3 }
 0x5ca   :  { %702 = vrot.lane.b32.xlu0 %v533_v26, %s4270_s2 }
 0x5cb   :  { %v698_v27 = vpop.permute.xlu1 %697 }
 0x5cc   :  { %v700_v28 = vmul.f32 %v698_v27, %v683_v9 }
 0x5ce   :  { %777 = vrot.lane.b32.xlu1 %v700_v28, %s4270_s2 }
 0x63c   :  { %v703_v29 = vpop.permute.xlu0 %702 }
 0x63d   :  { %3484 = vmatmul.mubr.msk.f32.vlgmr.msra.gmra.mrb[4].mxu1 %vm193_vm6, %v703_v29 }
 0x63e   :  { %3807 = vmatpush3.bf16.msra.mxu1 %v4465_v5  ;;  %3505 = vmatprep.mubr.msk.f32.mxu1 %vm4266_vm0, %v4267_v1 }
 0x63f   :  { %3808 = vmatprep.subr.bf16.mxu1 %v4265_v0 }
 0x640   :  { %v778_v30 = vpop.permute.xlu1 %777 }
 0x641   :  { %3495 = vmatmul.mubr.msk.f32.vlgmr.msra.gmra.mrb[8].mxu0 %vm193_vm6, %v778_v30 }
 0x642   :  { %3810 = vmatpush3.bf16.msra.mxu1 %v4468_v7  ;;  %3509 = vmatpush3.msk.msra.mxu0 %vm271_vm1, %v4473_v8 }
 0x643   :  { %3510 = vmatprep.mubr.msk.f32.mxu0 %vm4266_vm0, %v4267_v1  ;;  %3811 = vmatprep.subr.bf16.mxu0 %v4265_v0 }
 0x644   :  { %3817 = vmatprep.subr.bf16.mxu1 %v4265_v0 }
 0x645   :  { %3506 = vmatmul.mubr.msk.f32.vlgmr.msra.gmra.mrb[6].mxu1 %vm193_vm6, %v778_v30  ;;  %3511 = vmatmul.mubr.msk.f32.vlgmr.msra.gmra.mrb[10].mxu0 %vm267_vm2, %v874_v31 }
 0x646   :  { %3813 = vmatpush3.bf16.msra.mxu0 %v4500_v34  ;;  %3819 = vmatpush3.bf16.msra.mxu1 %v4502_v38 }
 0x647   :  { %3814 = vmatprep.subr.bf16.mxu0 %v4265_v0  ;;  %3521 = vmatprep.mubr.msk.f32.mxu0 %vm4266_vm0, %v4267_v1 }
 0x648   :  { %3820 = vmatprep.subr.bf16.mxu1 %v4265_v0  ;;  %3532 = vmatprep.mubr.msk.f32.mxu1 %vm4266_vm0, %v4267_v1 }
 0x64a   :  { %3816 = vmatpush3.bf16.msra.mxu0 %v4505_v41  ;;  %3822 = vmatpush3.bf16.msra.mxu1 %v4509_v42 }
 0x64b   :  { %3823 = vmatprep.subr.bf16.mxu0 %v4265_v0  ;;  %3546 = vmatprep.subr.mxu1 %v4267_v1 }
 0x710   :  { %v772_v32 = vpop.f32.mrb[4].mxu1 }
 0x711   :  { %v3485_v33 = vpop.f32.mrb[5].mxu1 }
 0x714   :  { %v847_v35 = vpop.f32.mrb[8].mxu0 }
 0x715   :  { %v848_v36 = vadd.f32 %v847_v35, %v772_v32  ;;  %v3496_v37 = vpop.f32.mrb[9].mxu0 }
 0x717   :  { %v851_v39 = vadd.f32 %v4545_v50, %v848_v36 }
 0x718   :  { %v941_v40 = vpop.f32.mrb[6].mxu1  ;;  %v1014_v43 = vpop.f32.mrb[10].mxu0 }
 0x719   :  { %v852_v44 = vmul.f32 %v851_v39, %v4486_v19  ;;  %v3507_v45 = vpop.f32.mrb[7].mxu1  ;;  %v1015_v46 = vadd.f32 %v1014_v43, %v941_v40  ;;  %v3512_v47 = vpop.f32.mrb[11].mxu0 }
 0x71b   :  { %3967 = vtanh.f32 %v852_v44  ;;  %v1018_v48 = vadd.f32 %v4484_v14, %v1015_v46 }
 0x71d   :  { %v1019_v49 = vmul.f32 %v1018_v48, %v4486_v19 }
 0x71f   :  { %3969 = vtanh.f32 %v1019_v49 }
 0x725   :  { %v3968_v51 = vpop.eup %3967 }
 0x726   :  { %v854_v52 = vmul.f32 %v3968_v51, %v4486_v19 }
 0x728   :  { %v855_v53 = vadd.f32 %v854_v52, %v4491_v23 }
 0x729   :  { %v3970_v54 = vpop.eup %3969 }
 0x72a   :  { %858 = vrot.lane.b32.xlu0 %v855_v53, %s4269_s8  ;;  %v1021_v55 = vmul.f32 %v3970_v54, %v4486_v19  ;;  %v856_v61 = vmul.f32 %v855_v53, %v4559_v17  ;;  %v1213_v17 = vld [vmem:[#allocation2 + $0x18] sm:$0xff] }
 0x72c   :  { %v1022_v56 = vadd.f32 %v1021_v55, %v4491_v23 }
 0x72e   :  { %1025 = vrot.lane.b32.xlu1 %v1022_v56, %s4269_s8  ;;  %v1023_v2 = vmul.f32 %v1022_v56, %v4563_v21 }
 0x79c   :  { %v859_v57 = vpop.permute.xlu0 %858 }
 0x79d   :  { %v861_v58 = vmul.f32 %v859_v57, %v855_v53 }
 0x79f   :  { %863 = vrot.lane.b32.xlu0 %v861_v58, %s4270_s2 }
 0x7a0   :  { %v1026_v59 = vpop.permute.xlu1 %1025 }
 0x7a1   :  { %v1028_v60 = vmul.f32 %v1026_v59, %v1022_v56 }
 0x7a3   :  { %1030 = vrot.lane.b32.xlu1 %v1028_v60, %s4270_s2 }
 0x811   :  { %v864_v62 = vpop.permute.xlu0 %863 }
 0x812   :  { %v4610_v63 = vadd.f32 %v864_v62, %v856_v61 }
 0x814   :  { %3971 = vtanh.f32 %v4610_v63 }
 0x815   :  { %v1031_v3 = vpop.permute.xlu1 %1030 }
 0x816   :  { %v4614_v4 = vadd.f32 %v1031_v3, %v1023_v2 }
 0x818   :  { %3973 = vtanh.f32 %v4614_v4 }
 0x81e   :  { %v3972_v6 = vpop.eup %3971 }
 0x81f   :  { %869 = vrot.lane.b32.xlu0 %v3972_v6, %s4269_s8 }
 0x822   :  { %v3974_v9 = vpop.eup %3973 }
 0x823   :  { %1036 = vrot.lane.b32.xlu1 %v3974_v9, %s4269_s8 }
 0x891   :  { %v870_v10 = vpop.permute.xlu0 %869 }
 0x892   :  { %v872_v11 = vmul.f32 %v870_v10, %v855_v53 }
 0x894   :  { %1041 = vrot.lane.b32.xlu0 %v872_v11, %s4270_s2 }
 0x895   :  { %v1037_v12 = vpop.permute.xlu1 %1036 }
 0x896   :  { %v1039_v13 = vmul.f32 %v1037_v12, %v1022_v56 }
 0x898   :  { %1116 = vrot.lane.b32.xlu1 %v1039_v13, %s4270_s2 }
 0x906   :  { %v1042_v15 = vpop.permute.xlu0 %1041 }
 0x907   :  { %3522 = vmatmul.mubr.msk.f32.vlgmr.msra.gmra.mrb[12].mxu0 %vm193_vm6, %v1042_v15 }
 0x908   :  { %3825 = vmatpush3.bf16.msra.mxu0 %v4465_v5  ;;  %3543 = vmatprep.mubr.msk.f32.mxu0 %vm4266_vm0, %v4267_v1 }
 0x909   :  { %3826 = vmatprep.subr.bf16.mxu0 %v4265_v0 }
 0x90a   :  { %v1117_v16 = vpop.permute.xlu1 %1116 }
 0x90b   :  { %3533 = vmatmul.mubr.msk.f32.vlgmr.msra.gmra.mrb[8].mxu1 %vm193_vm6, %v1117_v16 }
 0x90c   :  { %3828 = vmatpush3.bf16.msra.mxu0 %v4468_v7  ;;  %3547 = vmatpush3.msk.msra.mxu1 %vm271_vm1, %v4473_v8 }
 0x90d   :  { %3548 = vmatprep.mubr.msk.f32.mxu1 %vm4266_vm0, %v4267_v1  ;;  %3829 = vmatprep.subr.bf16.mxu1 %v4265_v0 }
 0x90e   :  { %3835 = vmatprep.subr.bf16.mxu0 %v4265_v0 }
 0x90f   :  { %3544 = vmatmul.mubr.msk.f32.vlgmr.msra.gmra.mrb[14].mxu0 %vm193_vm6, %v1117_v16  ;;  %3549 = vmatmul.mubr.msk.f32.vlgmr.msra.gmra.mrb[10].mxu1 %vm267_vm2, %v1213_v17 }
 0x910   :  { %3831 = vmatpush3.bf16.msra.mxu1 %v4500_v34  ;;  %3837 = vmatpush3.bf16.msra.mxu0 %v4502_v38 }
 0x911   :  { %3832 = vmatprep.subr.bf16.mxu1 %v4265_v0  ;;  %3559 = vmatprep.mubr.msk.f32.mxu1 %vm4266_vm0, %v4267_v1 }
 0x912   :  { %3838 = vmatprep.subr.bf16.mxu0 %v4265_v0  ;;  %3570 = vmatprep.mubr.msk.f32.mxu0 %vm4266_vm0, %v4267_v1 }
 0x914   :  { %3834 = vmatpush3.bf16.msra.mxu1 %v4505_v41  ;;  %3840 = vmatpush3.bf16.msra.mxu0 %v4509_v42 }
 0x915   :  { %3841 = vmatprep.subr.bf16.mxu1 %v4265_v0  ;;  %3584 = vmatprep.subr.mxu0 %v4267_v1 }
 0x9da   :  { %v1111_v18 = vpop.f32.mrb[12].mxu0 }
 0x9db   :  { %v3523_v20 = vpop.f32.mrb[13].mxu0 }
 0x9de   :  { %v1186_v21 = vpop.f32.mrb[8].mxu1 }
 0x9df   :  { %v1187_v22 = vadd.f32 %v1186_v21, %v1111_v18  ;;  %v3534_v24 = vpop.f32.mrb[9].mxu1 }
 0x9e1   :  { %v1190_v25 = vadd.f32 %v4545_v50, %v1187_v22 }
 0x9e2   :  { %v1280_v26 = vpop.f32.mrb[14].mxu0  ;;  %v1353_v27 = vpop.f32.mrb[10].mxu1 }
 0x9e3   :  { %v1191_v28 = vmul.f32 %v1190_v25, %v4486_v19  ;;  %v3545_v29 = vpop.f32.mrb[15].mxu0  ;;  %v1354_v30 = vadd.f32 %v1353_v27, %v1280_v26  ;;  %v3550_v31 = vpop.f32.mrb[11].mxu1 }
 0x9e5   :  { %3975 = vtanh.f32 %v1191_v28  ;;  %v1357_v32 = vadd.f32 %v4484_v14, %v1354_v30 }
 0x9e7   :  { %v1358_v33 = vmul.f32 %v1357_v32, %v4486_v19 }
 0x9e9   :  { %3977 = vtanh.f32 %v1358_v33 }
 0x9ef   :  { %v3976_v35 = vpop.eup %3975 }
 0x9f0   :  { %v1193_v36 = vmul.f32 %v3976_v35, %v4486_v19 }
 0x9f2   :  { %v1194_v37 = vadd.f32 %v1193_v36, %v4491_v23 }
 0x9f3   :  { %v3978_v39 = vpop.eup %3977 }
 0x9f4   :  { %1197 = vrot.lane.b32.xlu0 %v1194_v37, %s4269_s8  ;;  %v1360_v40 = vmul.f32 %v3978_v39, %v4486_v19  ;;  %v1195_v48 = vmul.f32 %v1194_v37, %v4610_v63  ;;  %v1552_v63 = vld [vmem:[#allocation2 + $0x20] sm:$0xff] }
 0x9f6   :  { %v1361_v43 = vadd.f32 %v1360_v40, %v4491_v23 }
 0x9f8   :  { %1364 = vrot.lane.b32.xlu1 %v1361_v43, %s4269_s8  ;;  %v1362_v52 = vmul.f32 %v1361_v43, %v4614_v4 }
 0xa66   :  { %v1198_v44 = vpop.permute.xlu0 %1197 }
 0xa67   :  { %v1200_v45 = vmul.f32 %v1198_v44, %v1194_v37 }
 0xa69   :  { %1202 = vrot.lane.b32.xlu0 %v1200_v45, %s4270_s2 }
 0xa6a   :  { %v1365_v46 = vpop.permute.xlu1 %1364 }
 0xa6b   :  { %v1367_v47 = vmul.f32 %v1365_v46, %v1361_v43 }
 0xa6d   :  { %1369 = vrot.lane.b32.xlu1 %v1367_v47, %s4270_s2 }
 0xadb   :  { %v1203_v49 = vpop.permute.xlu0 %1202 }
 0xadc   :  { %v4661_v51 = vadd.f32 %v1203_v49, %v1195_v48 }
 0xade   :  { %3979 = vtanh.f32 %v4661_v51 }
 0xadf   :  { %v1370_v53 = vpop.permute.xlu1 %1369 }
 0xae0   :  { %v4665_v54 = vadd.f32 %v1370_v53, %v1362_v52 }
 0xae2   :  { %3981 = vtanh.f32 %v4665_v54 }
 0xae8   :  { %v3980_v55 = vpop.eup %3979 }
 0xae9   :  { %1208 = vrot.lane.b32.xlu0 %v3980_v55, %s4269_s8 }
 0xaec   :  { %v3982_v56 = vpop.eup %3981 }
 0xaed   :  { %1375 = vrot.lane.b32.xlu1 %v3982_v56, %s4269_s8 }
 0xb5b   :  { %v1209_v57 = vpop.permute.xlu0 %1208 }
 0xb5c   :  { %v1211_v58 = vmul.f32 %v1209_v57, %v1194_v37 }
 0xb5e   :  { %1380 = vrot.lane.b32.xlu0 %v1211_v58, %s4270_s2 }
 0xb5f   :  { %v1376_v59 = vpop.permute.xlu1 %1375 }
 0xb60   :  { %v1378_v60 = vmul.f32 %v1376_v59, %v1361_v43 }
 0xb62   :  { %1455 = vrot.lane.b32.xlu1 %v1378_v60, %s4270_s2 }
 0xbd0   :  { %v1381_v61 = vpop.permute.xlu0 %1380 }
 0xbd1   :  { %3560 = vmatmul.mubr.msk.f32.vlgmr.msra.gmra.mrb[12].mxu1 %vm193_vm6, %v1381_v61 }
 0xbd2   :  { %3843 = vmatpush3.bf16.msra.mxu1 %v4465_v5  ;;  %3581 = vmatprep.mubr.msk.f32.mxu1 %vm4266_vm0, %v4267_v1 }
 0xbd3   :  { %3844 = vmatprep.subr.bf16.mxu1 %v4265_v0 }
 0xbd4   :  { %v1456_v62 = vpop.permute.xlu1 %1455 }
 0xbd5   :  { %3571 = vmatmul.mubr.msk.f32.vlgmr.msra.gmra.mrb[16].mxu0 %vm193_vm6, %v1456_v62 }
 0xbd6   :  { %3846 = vmatpush3.bf16.msra.mxu1 %v4468_v7  ;;  %3585 = vmatpush3.msk.msra.mxu0 %vm271_vm1, %v4473_v8 }
 0xbd7   :  { %3586 = vmatprep.mubr.msk.f32.mxu0 %vm4266_vm0, %v4267_v1  ;;  %3847 = vmatprep.subr.bf16.mxu0 %v4265_v0 }
 0xbd8   :  { %3853 = vmatprep.subr.bf16.mxu1 %v4265_v0 }
 0xbd9   :  { %3582 = vmatmul.mubr.msk.f32.vlgmr.msra.gmra.mrb[14].mxu1 %vm193_vm6, %v1456_v62  ;;  %3587 = vmatmul.mubr.msk.f32.vlgmr.msra.gmra.mrb[18].mxu0 %vm267_vm2, %v1552_v63 }
 0xbda   :  { %3849 = vmatpush3.bf16.msra.mxu0 %v4500_v34  ;;  %3855 = vmatpush3.bf16.msra.mxu1 %v4502_v38 }
 0xbdb   :  { %3850 = vmatprep.subr.bf16.mxu0 %v4265_v0  ;;  %3597 = vmatprep.mubr.msk.f32.mxu0 %vm4266_vm0, %v4267_v1 }
 0xbdc   :  { %3856 = vmatprep.subr.bf16.mxu1 %v4265_v0  ;;  %3608 = vmatprep.mubr.msk.f32.mxu1 %vm4266_vm0, %v4267_v1 }
 0xbde   :  { %3852 = vmatpush3.bf16.msra.mxu0 %v4505_v41  ;;  %3858 = vmatpush3.bf16.msra.mxu1 %v4509_v42 }
 0xbdf   :  { %3865 = vmatprep.subr.bf16.mxu1 %v4265_v0  ;;  %3859 = vmatprep.subr.bf16.mxu0 %v4265_v0 }
 0xca4   :  { %v1450_v2 = vpop.f32.mrb[12].mxu1 }
 0xca5   :  { %v3561_v3 = vpop.f32.mrb[13].mxu1 }
 0xca8   :  { %v1525_v4 = vpop.f32.mrb[16].mxu0 }
 0xca9   :  { %v1526_v6 = vadd.f32 %v1525_v4, %v1450_v2  ;;  %v3572_v9 = vpop.f32.mrb[17].mxu0 }
 0xcaa   :  { %v181_v9 = vld [vmem:[#allocation14] sm:$0xff] }
 0xcab   :  { %v1529_v10 = vadd.f32 %v4545_v50, %v1526_v6 }
 0xcac   :  { %v1619_v11 = vpop.f32.mrb[14].mxu1  ;;  %v1692_v12 = vpop.f32.mrb[18].mxu0 }
 0xcad   :  { %v1530_v13 = vmul.f32 %v1529_v10, %v4486_v19  ;;  %v3583_v15 = vpop.f32.mrb[15].mxu1  ;;  %v1693_v16 = vadd.f32 %v1692_v12, %v1619_v11  ;;  %v3588_v17 = vpop.f32.mrb[19].mxu0  ;;  %v182_v10 = vld [vmem:[#allocation14 + $0x8] sm:$0xff]  ;;  %v183_v11 = vld [vmem:[#allocation14 + $0x10] sm:$0xff] }
 0xcae   :  { %v4746_v12 = vpack.c.bf16 %v182_v10, %v181_v9 }
 0xcaf   :  { %3983 = vtanh.f32 %v1530_v13  ;;  %v1696_v18 = vadd.f32 %v4484_v14, %v1693_v16  ;;  %v184_v13 = vld [vmem:[#allocation14 + $0x18] sm:$0xff] }
 0xcb0   :  { %v4749_v15 = vpack.c.bf16 %v184_v13, %v183_v11 }
 0xcb1   :  { %v1697_v20 = vmul.f32 %v1696_v18, %v4486_v19 }
 0xcb3   :  { %3985 = vtanh.f32 %v1697_v20 }
 0xcb9   :  { %v3984_v21 = vpop.eup %3983 }
 0xcba   :  { %v1532_v22 = vmul.f32 %v3984_v21, %v4486_v19  ;;  %v1967_v21 = vld [vmem:[#allocation2 + $0x28] sm:$0xff] }
 0xcbc   :  { %v1533_v24 = vadd.f32 %v1532_v22, %v4491_v23  ;;  %v4776_v22 = vld [vmem:[#allocation16] ss:$0 sm:$0xff] }
 0xcbd   :  { %v3986_v25 = vpop.eup %3985 }
 0xcbe   :  { %1536 = vrot.lane.b32.xlu0 %v1533_v24, %s4269_s8  ;;  %v1699_v26 = vmul.f32 %v3986_v25, %v4486_v19  ;;  %v1534_v32 = vmul.f32 %v1533_v24, %v4661_v51 }
 0xcc0   :  { %v1700_v27 = vadd.f32 %v1699_v26, %v4491_v23 }
 0xcc2   :  { %1703 = vrot.lane.b32.xlu1 %v1700_v27, %s4269_s8  ;;  %v1701_v36 = vmul.f32 %v1700_v27, %v4665_v54 }
 0xd30   :  { %v1537_v28 = vpop.permute.xlu0 %1536 }
 0xd31   :  { %v1539_v29 = vmul.f32 %v1537_v28, %v1533_v24 }
 0xd33   :  { %1541 = vrot.lane.b32.xlu0 %v1539_v29, %s4270_s2 }
 0xd34   :  { %v1704_v30 = vpop.permute.xlu1 %1703 }
 0xd35   :  { %v1706_v31 = vmul.f32 %v1704_v30, %v1700_v27 }
 0xd37   :  { %1708 = vrot.lane.b32.xlu1 %v1706_v31, %s4270_s2 }
 0xda5   :  { %v1542_v33 = vpop.permute.xlu0 %1541 }
 0xda6   :  { %v1544_v35 = vadd.f32 %v1542_v33, %v1534_v32 }
 0xda8   :  { %3987 = vtanh.f32 %v1544_v35 }
 0xda9   :  { %v1709_v37 = vpop.permute.xlu1 %1708 }
 0xdaa   :  { %v4713_v39 = vadd.f32 %v1709_v37, %v1701_v36 }
 0xdac   :  { %3989 = vtanh.f32 %v4713_v39 }
 0xdb2   :  { %v3988_v40 = vpop.eup %3987 }
 0xdb3   :  { %1547 = vrot.lane.b32.xlu0 %v3988_v40, %s4269_s8 }
 0xdb6   :  { %v3990_v43 = vpop.eup %3989 }
 0xdb7   :  { %1714 = vrot.lane.b32.xlu1 %v3990_v43, %s4269_s8 }
 0xe25   :  { %v1548_v44 = vpop.permute.xlu0 %1547 }
 0xe26   :  { %v1550_v45 = vmul.f32 %v1548_v44, %v1533_v24 }
 0xe28   :  { %1719 = vrot.lane.b32.xlu0 %v1550_v45, %s4270_s2 }
 0xe29   :  { %v1715_v46 = vpop.permute.xlu1 %1714 }
 0xe2a   :  { %v1717_v47 = vmul.f32 %v1715_v46, %v1700_v27 }
 0xe2c   :  { %1794 = vrot.lane.b32.xlu1 %v1717_v47, %s4270_s2 }
 0xe9a   :  { %v1720_v48 = vpop.permute.xlu0 %1719 }
 0xe9b   :  { %3598 = vmatmul.mubr.msk.f32.vlgmr.msra.gmra.mrb[20].mxu0 %vm193_vm6, %v1720_v48 }
 0xe9c   :  { %3619 = vmatprep.mubr.msk.f32.mxu0 %vm4266_vm0, %v4267_v1  ;;  %3861 = vmatpush3.bf16.msra.mxu0 %v4746_v12 }
 0xe9d   :  { %3862 = vmatprep.subr.bf16.mxu0 %v4265_v0 }
 0xe9e   :  { %v1795_v49 = vpop.permute.xlu1 %1794 }
 0xe9f   :  { %3609 = vmatmul.mubr.msk.f32.vlgmr.msra.gmra.mrb[16].mxu1 %vm193_vm6, %v1795_v49 }
 0xea0   :  { %3867 = vmatpush3.bf16.msra.mxu1 %v4465_v5  ;;  %3630 = vmatprep.mubr.msk.f32.mxu1 %vm4266_vm0, %v4267_v1 }
 0xea1   :  { %3868 = vmatprep.subr.bf16.mxu1 %v4265_v0  ;;  %3864 = vmatpush3.bf16.msra.mxu0 %v4749_v15 }
 0xea2   :  { %3633 = vmatprep.subr.mxu0 %v4267_v1 }
 0xea4   :  { %3870 = vmatpush3.bf16.msra.mxu1 %v4468_v7 }
 0xea5   :  { %3871 = vmatprep.subr.bf16.mxu1 %v4265_v0 }
 0xea7   :  { %3631 = vmatmul.mubr.msk.f32.vlgmr.msra.gmra.mrb[18].mxu1 %vm193_vm6, %v1795_v49 }
 0xea8   :  { %3873 = vmatpush3.bf16.msra.mxu1 %v4500_v34  ;;  %3646 = vmatprep.mubr.msk.f32.mxu1 %vm4266_vm0, %v4267_v1 }
 0xea9   :  { %3874 = vmatprep.subr.bf16.mxu1 %v4265_v0 }
 0xeac   :  { %3876 = vmatpush3.bf16.msra.mxu1 %v4505_v41 }
 0xead   :  { %3883 = vmatprep.subr.bf16.mxu1 %v4265_v0 }
 0xf6e   :  { %v1789_v51 = vpop.f32.mrb[20].mxu0 }
 0xf6f   :  { %v3599_v52 = vpop.f32.mrb[21].mxu0 }
 0xf72   :  { %v1864_v53 = vpop.f32.mrb[16].mxu1 }
 0xf73   :  { %v1865_v54 = vadd.f32 %v1864_v53, %v1789_v51  ;;  %v3610_v55 = vpop.f32.mrb[17].mxu1 }
 0xf75   :  { %v1868_v56 = vadd.f32 %v4545_v50, %v1865_v54 }
 0xf77   :  { %v1869_v57 = vmul.f32 %v1868_v56, %v4486_v19 }
 0xf79   :  { %3991 = vtanh.f32 %v1869_v57 }
 0xf7a   :  { %v2034_v58 = vpop.f32.mrb[18].mxu1 }
 0xf7b   :  { %v3632_v59 = vpop.f32.mrb[19].mxu1 }
 0xf83   :  { %v3992_v60 = vpop.eup %3991 }
 0xf84   :  { %v1871_v61 = vmul.f32 %v3992_v60, %v4486_v19 }
 0xf86   :  { %v1872_v62 = vadd.f32 %v1871_v61, %v4491_v23 }
 0xf88   :  { %1875 = vrot.lane.b32.xlu0 %v1872_v62, %s4269_s8  ;;  %v1873_v3 = vmul.f32 %v1872_v62, %v1544_v35 }
 0xffa   :  { %v1876_v63 = vpop.permute.xlu0 %1875 }
 0xffb   :  { %v1878_v2 = vmul.f32 %v1876_v63, %v1872_v62 }
 0xffd   :  { %1880 = vrot.lane.b32.xlu1 %v1878_v2, %s4270_s2 }
0x106f   :  { %v1881_v4 = vpop.permute.xlu1 %1880 }
0x1070   :  { %v4743_v6 = vadd.f32 %v1881_v4, %v1873_v3 }
0x1072   :  { %3993 = vtanh.f32 %v4743_v6 }
0x107c   :  { %v3994_v16 = vpop.eup %3993 }
0x107d   :  { %1886 = vrot.lane.b32.xlu0 %v3994_v16, %s4269_s8 }
0x10ef   :  { %v1887_v17 = vpop.permute.xlu0 %1886 }
0x10f0   :  { %v1889_v18 = vmul.f32 %v1887_v17, %v1872_v62 }
0x10f2   :  { %1891 = vrot.lane.b32.xlu1 %v1889_v18, %s4270_s2 }
0x1164   :  { %v1892_v20 = vpop.permute.xlu1 %1891 }
0x1165   :  { %3620 = vmatmul.mubr.msk.f32.vlgmr.msra.gmra.mrb[22].mxu0 %vm193_vm6, %v1892_v20  ;;  %3647 = vmatmul.mubr.msk.f32.vlgmr.msra.gmra.mrb[20].mxu1 %vm193_vm6, %v1892_v20 }
0x1166   :  { %3634 = vmatpush3.msk.msra.mxu0 %vm271_vm1, %v4473_v8  ;;  %3635 = vmatprep.mubr.msk.f32.mxu0 %vm4266_vm0, %v4267_v1 }
0x1167   :  { %3877 = vmatprep.subr.bf16.mxu0 %v4265_v0  ;;  %3885 = vmatpush3.bf16.msra.mxu1 %v4746_v12 }
0x1168   :  { %3886 = vmatprep.subr.bf16.mxu1 %v4265_v0  ;;  %3668 = vmatprep.mubr.msk.f32.mxu1 %vm4266_vm0, %v4267_v1 }
0x1169   :  { %3636 = vmatmul.mubr.msk.f32.vlgmr.msra.gmra.mrb[24].mxu0 %vm267_vm2, %v1967_v21 }
0x116a   :  { %3879 = vmatpush3.bf16.msra.mxu0 %v4502_v38  ;;  %3657 = vmatprep.mubr.msk.f32.mxu0 %vm4266_vm0, %v4267_v1 }
0x116b   :  { %3880 = vmatprep.subr.bf16.mxu0 %v4265_v0  ;;  %3888 = vmatpush3.bf16.msra.mxu1 %v4749_v15 }
0x116c   :  { %3682 = vmatprep.subr.mxu1 %v4267_v1 }
0x116e   :  { %3882 = vmatpush3.bf16.msra.mxu0 %v4509_v42 }
0x116f   :  { %3889 = vmatprep.subr.bf16.mxu0 %v4265_v0 }
0x1238   :  { %v1961_v24 = vpop.f32.mrb[22].mxu0  ;;  %v2199_v25 = vpop.f32.mrb[20].mxu1 }
0x1239   :  { %v1962_v26 = vadd.f32 %v4776_v22, %v1961_v24  ;;  %v3621_v27 = vpop.f32.mrb[23].mxu0  ;;  %v3648_v28 = vpop.f32.mrb[21].mxu1 }
0x123b   :  { %1965 = vst [vmem:[#allocation17] sm:$0xff] %v1962_v26 }
0x123c   :  { %v2107_v29 = vpop.f32.mrb[24].mxu0 }
0x123d   :  { %v2108_v30 = vadd.f32 %v2107_v29, %v2034_v58  ;;  %v3637_v31 = vpop.f32.mrb[25].mxu0 }
0x123f   :  { %v2111_v32 = vadd.f32 %v4484_v14, %v2108_v30 }
0x1241   :  { %v2112_v33 = vmul.f32 %v2111_v32, %v4486_v19 }
0x1243   :  { %3995 = vtanh.f32 %v2112_v33 }
0x124d   :  { %v3996_v35 = vpop.eup %3995 }
0x124e   :  { %v2114_v36 = vmul.f32 %v3996_v35, %v4486_v19 }
0x1250   :  { %v2115_v37 = vadd.f32 %v2114_v36, %v4491_v23 }
0x1252   :  { %2118 = vrot.lane.b32.xlu0 %v2115_v37, %s4269_s8  ;;  %v2116_v44 = vmul.f32 %v2115_v37, %v4713_v39 }
0x12c4   :  { %v2119_v40 = vpop.permute.xlu0 %2118 }
0x12c5   :  { %v2121_v43 = vmul.f32 %v2119_v40, %v2115_v37 }
0x12c7   :  { %2123 = vrot.lane.b32.xlu1 %v2121_v43, %s4270_s2 }
0x1339   :  { %v2124_v45 = vpop.permute.xlu1 %2123 }
0x133a   :  { %v4786_v46 = vadd.f32 %v2124_v45, %v2116_v44 }
0x133c   :  { %3997 = vtanh.f32 %v4786_v46 }
0x1346   :  { %v3998_v47 = vpop.eup %3997 }
0x1347   :  { %2129 = vrot.lane.b32.xlu0 %v3998_v47, %s4269_s8 }
0x13b9   :  { %v2130_v48 = vpop.permute.xlu0 %2129 }
0x13ba   :  { %v2132_v49 = vmul.f32 %v2130_v48, %v2115_v37 }
0x13bc   :  { %2204 = vrot.lane.b32.xlu1 %v2132_v49, %s4270_s2 }
0x142e   :  { %v2205_v51 = vpop.permute.xlu1 %2204 }
0x142f   :  { %3658 = vmatmul.mubr.msk.f32.vlgmr.msra.gmra.mrb[26].mxu0 %vm193_vm6, %v2205_v51 }
0x1430   :  { %3891 = vmatpush3.bf16.msra.mxu0 %v4465_v5  ;;  %3679 = vmatprep.mubr.msk.f32.mxu0 %vm4266_vm0, %v4267_v1 }
0x1431   :  { %3892 = vmatprep.subr.bf16.mxu0 %v4265_v0 }
0x1434   :  { %3894 = vmatpush3.bf16.msra.mxu0 %v4468_v7 }
0x1435   :  { %3895 = vmatprep.subr.bf16.mxu0 %v4265_v0 }
0x1437   :  { %3680 = vmatmul.mubr.msk.f32.vlgmr.msra.gmra.mrb[28].mxu0 %vm193_vm6, %v2205_v51 }
0x1438   :  { %3897 = vmatpush3.bf16.msra.mxu0 %v4500_v34  ;;  %3695 = vmatprep.mubr.msk.f32.mxu0 %vm4266_vm0, %v4267_v1 }
0x1439   :  { %3898 = vmatprep.subr.bf16.mxu0 %v4265_v0 }
0x143c   :  { %3900 = vmatpush3.bf16.msra.mxu0 %v4505_v41 }
0x143d   :  { %3907 = vmatprep.subr.bf16.mxu0 %v4265_v0 }
0x1502   :  { %v2274_v39 = vpop.f32.mrb[26].mxu0 }
0x1503   :  { %v2275_v52 = vadd.f32 %v2274_v39, %v2199_v25  ;;  %v3659_v53 = vpop.f32.mrb[27].mxu0 }
0x1505   :  { %v2278_v54 = vadd.f32 %v4545_v50, %v2275_v52 }
0x1507   :  { %v2279_v55 = vmul.f32 %v2278_v54, %v4486_v19 }
0x1509   :  { %3999 = vtanh.f32 %v2279_v55 }
0x150a   :  { %v2445_v56 = vpop.f32.mrb[28].mxu0 }
0x150b   :  { %v3681_v57 = vpop.f32.mrb[29].mxu0 }
0x150c   :  { %v4019_v57 = vld [vmem:[#allocation5] sm:$0xf] }
0x1513   :  { %v4000_v58 = vpop.eup %3999 }
0x1514   :  { %v2281_v59 = vmul.f32 %v4000_v58, %v4486_v19  ;;  %v2789_v58 = vld [vmem:[#allocation2 + $0x38] sm:$0xff] }
0x1516   :  { %v2282_v60 = vadd.f32 %v2281_v59, %v4491_v23 }
0x1518   :  { %2285 = vrot.lane.b32.xlu0 %v2282_v60, %s4269_s8  ;;  %v2283_v63 = vmul.f32 %v2282_v60, %v4743_v6  ;;  %v2378_v6 = vld [vmem:[#allocation2 + $0x30] sm:$0xff] }
0x158a   :  { %v2286_v61 = vpop.permute.xlu0 %2285 }
0x158b   :  { %v2288_v62 = vmul.f32 %v2286_v61, %v2282_v60 }
0x158d   :  { %2290 = vrot.lane.b32.xlu1 %v2288_v62, %s4270_s2 }
0x15ff   :  { %v2291_v2 = vpop.permute.xlu1 %2290 }
0x1600   :  { %v4812_v3 = vadd.f32 %v2291_v2, %v2283_v63 }
0x1602   :  { %4001 = vtanh.f32 %v4812_v3 }
0x160c   :  { %v4002_v4 = vpop.eup %4001 }
0x160d   :  { %2296 = vrot.lane.b32.xlu0 %v4002_v4, %s4269_s8 }
0x167f   :  { %v2297_v9 = vpop.permute.xlu0 %2296 }
0x1680   :  { %v2299_v10 = vmul.f32 %v2297_v9, %v2282_v60 }
0x1682   :  { %2301 = vrot.lane.b32.xlu1 %v2299_v10, %s4270_s2 }
0x16f4   :  { %v2302_v11 = vpop.permute.xlu1 %2301 }
0x16f5   :  { %3669 = vmatmul.mubr.msk.f32.vlgmr.msra.gmra.mrb[22].mxu1 %vm193_vm6, %v2302_v11  ;;  %3696 = vmatmul.mubr.msk.f32.vlgmr.msra.gmra.mrb[30].mxu0 %vm193_vm6, %v2302_v11 }
0x16f6   :  { %3683 = vmatpush3.msk.msra.mxu1 %vm271_vm1, %v4473_v8  ;;  %3684 = vmatprep.mubr.msk.f32.mxu1 %vm4266_vm0, %v4267_v1 }
0x16f7   :  { %3901 = vmatprep.subr.bf16.mxu1 %v4265_v0  ;;  %3909 = vmatpush3.bf16.msra.mxu0 %v4746_v12 }
0x16f8   :  { %3910 = vmatprep.subr.bf16.mxu0 %v4265_v0  ;;  %3717 = vmatprep.mubr.msk.f32.mxu0 %vm4266_vm0, %v4267_v1 }
0x16f9   :  { %3685 = vmatmul.mubr.msk.f32.vlgmr.msra.gmra.mrb[24].mxu1 %vm267_vm2, %v2378_v6 }
0x16fa   :  { %3903 = vmatpush3.bf16.msra.mxu1 %v4502_v38  ;;  %3706 = vmatprep.mubr.msk.f32.mxu1 %vm4266_vm0, %v4267_v1 }
0x16fb   :  { %3904 = vmatprep.subr.bf16.mxu1 %v4265_v0  ;;  %3912 = vmatpush3.bf16.msra.mxu0 %v4749_v15 }
0x16fc   :  { %3731 = vmatprep.subr.mxu0 %v4267_v1 }
0x16fe   :  { %3906 = vmatpush3.bf16.msra.mxu1 %v4509_v42 }
0x16ff   :  { %3913 = vmatprep.subr.bf16.mxu1 %v4265_v0 }
0x17c8   :  { %v2371_v8 = vpop.f32.mrb[22].mxu1  ;;  %v2610_v13 = vpop.f32.mrb[30].mxu0 }
0x17c9   :  { %v2372_v16 = vadd.f32 %v4776_v22, %v2371_v8  ;;  %v3670_v17 = vpop.f32.mrb[23].mxu1  ;;  %v3697_v18 = vpop.f32.mrb[31].mxu0 }
0x17cb   :  { %2376 = vst [vmem:[#allocation17 + $0x8] sm:$0xff] %v2372_v16 }
0x17cc   :  { %v2518_v20 = vpop.f32.mrb[24].mxu1 }
0x17cd   :  { %v2519_v21 = vadd.f32 %v2518_v20, %v2445_v56  ;;  %v3686_v24 = vpop.f32.mrb[25].mxu1 }
0x17cf   :  { %v2522_v25 = vadd.f32 %v4484_v14, %v2519_v21 }
0x17d1   :  { %v2523_v26 = vmul.f32 %v2522_v25, %v4486_v19  ;;  %v4021_v25 = vld [vmem:[#allocation13] ss:$0 sm:$0xff] }
0x17d3   :  { %4003 = vtanh.f32 %v2523_v26 }
0x17dd   :  { %v4004_v27 = vpop.eup %4003 }
0x17de   :  { %v2525_v28 = vmul.f32 %v4004_v27, %v4486_v19 }
0x17e0   :  { %v2526_v29 = vadd.f32 %v2525_v28, %v4491_v23 }
0x17e2   :  { %2529 = vrot.lane.b32.xlu0 %v2526_v29, %s4269_s8  ;;  %v2527_v32 = vmul.f32 %v2526_v29, %v4786_v46 }
0x1854   :  { %v2530_v30 = vpop.permute.xlu0 %2529 }
0x1855   :  { %v2532_v31 = vmul.f32 %v2530_v30, %v2526_v29 }
0x1857   :  { %2534 = vrot.lane.b32.xlu1 %v2532_v31, %s4270_s2 }
0x18c9   :  { %v2535_v33 = vpop.permute.xlu1 %2534 }
0x18ca   :  { %v4845_v35 = vadd.f32 %v2535_v33, %v2527_v32 }
0x18cc   :  { %4005 = vtanh.f32 %v4845_v35 }
0x18d6   :  { %v4006_v14 = vpop.eup %4005 }
0x18d7   :  { %2540 = vrot.lane.b32.xlu0 %v4006_v14, %s4269_s8 }
0x1949   :  { %v2541_v36 = vpop.permute.xlu0 %2540 }
0x194a   :  { %v2543_v37 = vmul.f32 %v2541_v36, %v2526_v29 }
0x194c   :  { %2615 = vrot.lane.b32.xlu1 %v2543_v37, %s4270_s2 }
0x19be   :  { %v2616_v40 = vpop.permute.xlu1 %2615 }
0x19bf   :  { %3707 = vmatmul.mubr.msk.f32.vlgmr.msra.gmra.mrb[26].mxu1 %vm193_vm6, %v2616_v40 }
0x19c0   :  { %3915 = vmatpush3.bf16.msra.mxu1 %v4465_v5  ;;  %3728 = vmatprep.mubr.msk.f32.mxu1 %vm4266_vm0, %v4267_v1 }
0x19c1   :  { %3916 = vmatprep.subr.bf16.mxu1 %v4265_v0 }
0x19c4   :  { %3918 = vmatpush3.bf16.msra.mxu1 %v4468_v7 }
0x19c5   :  { %3919 = vmatprep.subr.bf16.mxu1 %v4265_v0 }
0x19c7   :  { %3729 = vmatmul.mubr.msk.f32.vlgmr.msra.gmra.mrb[28].mxu1 %vm193_vm6, %v2616_v40 }
0x19c8   :  { %3921 = vmatpush3.bf16.msra.mxu1 %v4500_v34  ;;  %3744 = vmatprep.mubr.msk.f32.mxu1 %vm4266_vm0, %v4267_v1 }
0x19c9   :  { %3922 = vmatprep.subr.bf16.mxu1 %v4265_v0 }
0x19cc   :  { %3924 = vmatpush3.bf16.msra.mxu1 %v4505_v41 }
0x19cd   :  { %3931 = vmatprep.subr.bf16.mxu1 %v4265_v0 }
0x1a92   :  { %v2685_v5 = vpop.f32.mrb[26].mxu1 }
0x1a93   :  { %v2686_v43 = vadd.f32 %v2685_v5, %v2610_v13  ;;  %v3708_v44 = vpop.f32.mrb[27].mxu1 }
0x1a95   :  { %v2689_v7 = vadd.f32 %v4545_v50, %v2686_v43 }
0x1a97   :  { %v2690_v45 = vmul.f32 %v2689_v7, %v4486_v19 }
0x1a99   :  { %4007 = vtanh.f32 %v2690_v45 }
0x1a9a   :  { %v2856_v46 = vpop.f32.mrb[28].mxu1 }
0x1a9b   :  { %v3730_v47 = vpop.f32.mrb[29].mxu1 }
0x1aa3   :  { %v4008_v34 = vpop.eup %4007 }
0x1aa4   :  { %v2692_v48 = vmul.f32 %v4008_v34, %v4486_v19 }
0x1aa6   :  { %v2693_v49 = vadd.f32 %v2692_v48, %v4491_v23 }
0x1aa8   :  { %2696 = vrot.lane.b32.xlu0 %v2693_v49, %s4269_s8  ;;  %v2694_v39 = vmul.f32 %v2693_v49, %v4812_v3 }
0x1b1a   :  { %v2697_v41 = vpop.permute.xlu0 %2696 }
0x1b1b   :  { %v2699_v51 = vmul.f32 %v2697_v41, %v2693_v49 }
0x1b1d   :  { %2701 = vrot.lane.b32.xlu1 %v2699_v51, %s4270_s2 }
0x1b8f   :  { %v2702_v52 = vpop.permute.xlu1 %2701 }
0x1b90   :  { %v4871_v50 = vadd.f32 %v2702_v52, %v2694_v39 }
0x1b92   :  { %4009 = vtanh.f32 %v4871_v50 }
0x1b9c   :  { %v4010_v53 = vpop.eup %4009 }
0x1b9d   :  { %2707 = vrot.lane.b32.xlu0 %v4010_v53, %s4269_s8 }
0x1c0f   :  { %v2708_v54 = vpop.permute.xlu0 %2707 }
0x1c10   :  { %v2710_v55 = vmul.f32 %v2708_v54, %v2693_v49 }
0x1c12   :  { %2712 = vrot.lane.b32.xlu1 %v2710_v55, %s4270_s2 }
0x1c84   :  { %v2713_v56 = vpop.permute.xlu1 %2712 }
0x1c85   :  { %3718 = vmatmul.mubr.msk.f32.vlgmr.msra.gmra.mrb[32].mxu0 %vm193_vm6, %v2713_v56  ;;  %3745 = vmatmul.mubr.msk.f32.vlgmr.msra.gmra.mrb[30].mxu1 %vm193_vm6, %v2713_v56 }
0x1c86   :  { %3732 = vmatpush3.msk.msra.mxu0 %vm271_vm1, %v4019_v57  ;;  %3733 = vmatprep.mubr.msk.f32.mxu0 %vm4266_vm0, %v4267_v1 }
0x1c87   :  { %3925 = vmatprep.subr.bf16.mxu0 %v4265_v0  ;;  %3933 = vmatpush3.bf16.msra.mxu1 %v4746_v12 }
0x1c88   :  { %3934 = vmatprep.subr.bf16.mxu1 %v4265_v0  ;;  %3766 = vmatprep.mubr.msk.f32.mxu1 %vm4266_vm0, %v4267_v1 }
0x1c89   :  { %3734 = vmatmul.mubr.msk.f32.vlgmr.msra.gmra.mrb[34].mxu0 %vm267_vm2, %v2789_v58 }
0x1c8a   :  { %3927 = vmatpush3.bf16.msra.mxu0 %v4502_v38  ;;  %3755 = vmatprep.mubr.msk.f32.mxu0 %vm4266_vm0, %v4267_v1  ;;  %v4020_v38 = vld [vmem:[#allocation8] ss:$0 sm:$0xff] }
0x1c8b   :  { %3928 = vmatprep.subr.bf16.mxu0 %v4265_v0  ;;  %3936 = vmatpush3.bf16.msra.mxu1 %v4749_v15 }
0x1c8e   :  { %3930 = vmatpush3.bf16.msra.mxu0 %v4509_v42 }
0x1d58   :  { %v2782_v59 = vpop.f32.mrb[32].mxu0  ;;  %v3021_v12 = vpop.f32.mrb[30].mxu1 }
0x1d59   :  { %v2783_v60 = vadd.f32 %v4776_v22, %v2782_v59  ;;  %v3719_v61 = vpop.f32.mrb[33].mxu0  ;;  %v3746_v62 = vpop.f32.mrb[31].mxu1 }
0x1d5b   :  { %2787 = vst [vmem:[#allocation17 + $0x10] sm:$0xff] %v2783_v60 }
0x1d5c   :  { %v2929_v63 = vpop.f32.mrb[34].mxu0 }
0x1d5d   :  { %v2930_v2 = vadd.f32 %v2929_v63, %v2856_v46  ;;  %v3735_v3 = vpop.f32.mrb[35].mxu0 }
0x1d5f   :  { %v2933_v4 = vadd.f32 %v4020_v38, %v2930_v2 }
0x1d61   :  { %v2934_v1 = vmul.f32 %v2933_v4, %v4486_v19 }
0x1d63   :  { %4011 = vtanh.f32 %v2934_v1 }
0x1d6d   :  { %v4012_v0 = vpop.eup %4011 }
0x1d6e   :  { %v2936_v15 = vmul.f32 %v4012_v0, %v4486_v19 }
0x1d70   :  { %v2937_v42 = vadd.f32 %v2936_v15, %v4491_v23 }
0x1d72   :  { %2940 = vrot.lane.b32.xlu0 %v2937_v42, %s4269_s8  ;;  %v2938_v11 = vmul.f32 %v2937_v42, %v4845_v35 }
0x1de4   :  { %v2941_v9 = vpop.permute.xlu0 %2940 }
0x1de5   :  { %v2943_v10 = vmul.f32 %v2941_v9, %v2937_v42 }
0x1de7   :  { %2945 = vrot.lane.b32.xlu1 %v2943_v10, %s4270_s2 }
0x1e59   :  { %v2946_v6 = vpop.permute.xlu1 %2945 }
0x1e5a   :  { %v2948_v8 = vadd.f32 %v2946_v6, %v2938_v11 }
0x1e5c   :  { %4013 = vtanh.f32 %v2948_v8 }
0x1e66   :  { %v4014_v13 = vpop.eup %4013 }
0x1e67   :  { %2951 = vrot.lane.b32.xlu0 %v4014_v13, %s4269_s8 }
0x1ed9   :  { %v2952_v16 = vpop.permute.xlu0 %2951 }
0x1eda   :  { %v2954_v17 = vmul.f32 %v2952_v16, %v2937_v42 }
0x1edc   :  { %3026 = vrot.lane.b32.xlu1 %v2954_v17, %s4270_s2 }
0x1f4e   :  { %v3027_v18 = vpop.permute.xlu1 %3026 }
0x1f4f   :  { %3756 = vmatmul.mubr.msk.f32.vlgmr.msra.gmra.mrb[36].mxu0 %vm193_vm6, %v3027_v18 }
0x2022   :  { %v3096_v20 = vpop.f32.mrb[36].mxu0 }
0x2023   :  { %v3097_v21 = vadd.f32 %v3096_v20, %v3021_v12  ;;  %v3757_v24 = vpop.f32.mrb[37].mxu0 }
0x2025   :  { %v3100_v26 = vadd.f32 %v4021_v25, %v3097_v21 }
0x2027   :  { %v3101_v27 = vmul.f32 %v3100_v26, %v4486_v19 }
0x2029   :  { %4015 = vtanh.f32 %v3101_v27 }
0x2033   :  { %v4016_v28 = vpop.eup %4015 }
0x2034   :  { %v3103_v29 = vmul.f32 %v4016_v28, %v4486_v19 }
0x2036   :  { %v3104_v30 = vadd.f32 %v3103_v29, %v4491_v23 }
0x2038   :  { %3107 = vrot.lane.b32.xlu0 %v3104_v30, %s4269_s8  ;;  %v3105_v33 = vmul.f32 %v3104_v30, %v4871_v50 }
0x20aa   :  { %v3108_v31 = vpop.permute.xlu0 %3107 }
0x20ab   :  { %v3110_v32 = vmul.f32 %v3108_v31, %v3104_v30 }
0x20ad   :  { %3112 = vrot.lane.b32.xlu1 %v3110_v32, %s4270_s2 }
0x211f   :  { %v3113_v35 = vpop.permute.xlu1 %3112 }
0x2120   :  { %v3115_v14 = vadd.f32 %v3113_v35, %v3105_v33 }
0x2122   :  { %4017 = vtanh.f32 %v3115_v14 }
0x212c   :  { %v4018_v36 = vpop.eup %4017 }
0x212d   :  { %3118 = vrot.lane.b32.xlu0 %v4018_v36, %s4269_s8 }
0x219f   :  { %v3119_v37 = vpop.permute.xlu0 %3118 }
0x21a0   :  { %v3121_v40 = vmul.f32 %v3119_v37, %v3104_v30 }
0x21a2   :  { %3123 = vrot.lane.b32.xlu1 %v3121_v40, %s4270_s2 }
0x2214   :  { %v3124_v19 = vpop.permute.xlu1 %3123 }
0x2215   :  { %3767 = vmatmul.mubr.msk.f32.vlgmr.msra.gmra.mrb[32].mxu1 %vm193_vm6, %v3124_v19 }
0x22e8   :  { %v3193_v23 = vpop.f32.mrb[32].mxu1 }
0x22e9   :  { %v3194_v5 = vadd.f32 %v4776_v22, %v3193_v23  ;;  %v3768_v43 = vpop.f32.mrb[33].mxu1 }
0x22eb   :  { %3198 = vst [vmem:[#allocation17 + $0x18] sm:$0xff] %v3194_v5 }
0x22ec   :  { %4231 = shalt.err (!%p4228_p6)
}
0x22ed   :  { %s4232_s30 = scalar_lea.hbm %s4937_s9, 512 }
0x22ee   :  { %p4233_p7 = scmp.ne.s32.totalorder %s4937_s9, %s4232_s30  ;;  %p4236_p8 = scmp.lt.u32.totalorder %s4232_s30, %s4937_s9 }
0x22f0   :  { %p4238_p9 = pnand %p4236_p8, %p4233_p7 }
0x22f2   :  { %4241 = shalt.err (!%p4238_p9)
}
0x22f3   :  { %3210 = dma.vmem_to_hbm [thread:$0]  %s3205_s16, 512, %s4937_s9, [#allocation4], %s4258_s12, %s4258_s12, %s4259_s24  }
0x22f4   :  { %4252 = dma.done.wait [#allocation4], 512  }
0x22f5   :  { %4253 = vsyncadd [#allocation4], 4294966784 }
0x22f6   :  { %3214 = vsyncpa [#allocation3], 1 }
0x22f7   :  { %3215 = vsyncpa [#allocation6], 1 }
0x22f8   :  { %3216 = vsyncpa [#allocation9], 1 }
0x22f9   :  { %3217 = vsyncpa [#allocation12], 1 }
0x22fa   :  { %3218 = vsyncpa [#allocation15], 1 }
0x22fb   :  { %3219 = vsyncpa [#allocation4], 1 }

</bundles_post_ra>
